<compile_context>
chip_gen: v5e
topology: v5e:2x2
jax: 0.10.0
libtpu: 0.0.40
codegen_flags: <defaults>
</compile_context>

<pallas_src>
import jax
import jax.numpy as jnp
from jax.experimental import pallas as pl
from jax.experimental.pallas import tpu as pltpu


_LANE = 128                        # TPU lane width
_WIDE_LANE = 1024                  # preferred lane-dense width
_TARGET_TILE_BYTES = 4 * 1024 * 1024   # ~4 MiB per VMEM buffer (x4 in flight = ~16 MiB)
_MIN_KERNEL_BYTES = 1024 * 1024    # below this, fused XLA beats kernel-launch overhead
_VMEM_LIMIT_BYTES = 32 * 1024 * 1024


# ----------------------------- Pallas kernel -------------------------------

def _neg_scale_kernel(scale_ref, g_ref, o_ref):
    # grad_x = -scale * grad_y. scale is f32 in SMEM; multiply in f32 on the VPU,
    # cast back to the gradient dtype on store.
    s = scale_ref[0]
    g = g_ref[...].astype(jnp.float32)
    o_ref[...] = ((-s) * g).astype(o_ref.dtype)


def _plan(shape, dtype):
    """Static (trace-time) tiling plan. Returns None => use the fused XLA fallback."""
    n = 1
    for d in shape:
        n *= int(d)
    itemsize = jnp.dtype(dtype).itemsize
    if n * itemsize < _MIN_KERNEL_BYTES:
        return None                          # tiny gradient: not worth a kernel launch
    # Lane-dense layout with zero padding; fall back if the size doesn't divide.
    if n % _WIDE_LANE == 0:
        lane = _WIDE_LANE
    elif n % _LANE == 0:
        lane = _LANE
    else:
        return None                          # padding would triple HBM traffic -> XLA
    rows = n // lane
    # Row granularity keeps whole packed sublane tiles per dtype: 8 (f32) / 16 (bf16) / 32 (i8).
    gran = 8 * max(1, 4 // itemsize)
    # Constant-byte tiles across dtypes (~_TARGET_TILE_BYTES per buffer).
    block_rows = max(gran, (_TARGET_TILE_BYTES // (lane * itemsize)) // gran * gran)
    # Guarantee >= 2 tiles when rows permit so v7x's two TensorCores both stream.
    if rows >= 2 * gran:
        block_rows = min(block_rows, max(gran, (rows // 2) // gran * gran))
    block_rows = min(block_rows, rows)
    return lane, rows, block_rows, n, itemsize


def _neg_scale_pallas(g, scale, plan):
    lane, rows, block_rows, n, itemsize = plan
    orig_shape, orig_dtype = g.shape, g.dtype

    g2 = g.reshape(rows, lane)                # pure reshape; no pad, no extra HBM pass
    scale_arr = jnp.asarray(scale, dtype=jnp.float32).reshape(1)
    grid = (pl.cdiv(rows, block_rows),)

    out = pl.pallas_call(
        _neg_scale_kernel,
        out_shape=jax.ShapeDtypeStruct((rows, lane), orig_dtype),
        grid=grid,
        in_specs=[
            pl.BlockSpec(memory_space=pltpu.SMEM),               # f32 scalar scale
            pl.BlockSpec((block_rows, lane), lambda i: (i, 0)),  # gradient tile
        ],
        out_specs=pl.BlockSpec((block_rows, lane), lambda i: (i, 0)),
        input_output_aliases={1: 0},          # write the scaled gradient in place
        cost_estimate=pl.CostEstimate(
            flops=n, transcendentals=0, bytes_accessed=2 * n * itemsize),
        compiler_params=pltpu.CompilerParams(
            dimension_semantics=("parallel",),
            vmem_limit_bytes=_VMEM_LIMIT_BYTES),
    )(scale_arr, g2)

    return out.reshape(orig_shape)


def _neg_scale_xla(g, scale):
    # Single fused elementwise pass; already at HBM roofline for small/awkward shapes.
    s = jnp.asarray(scale, dtype=jnp.float32)
    return (g.astype(jnp.float32) * (-s)).astype(g.dtype)


def _neg_scale(g, scale):
    plan = _plan(g.shape, g.dtype)
    if plan is None:
        return _neg_scale_xla(g, scale)
    return _neg_scale_pallas(g, scale, plan)


# ----------------------- custom_vjp gradient reversal -----------------------

@jax.custom_vjp
def gradient_reversal(x, scale):
    # Forward is the identity; no kernel launch, no HBM round-trip.
    return x


def _grl_fwd(x, scale):
    return x, scale


def _grl_bwd(scale, g):
    # grad wrt x: -scale * g. grad wrt scale: zeros (forward value ignores scale).
    return _neg_scale(g, scale), jnp.zeros_like(jnp.asarray(scale))


gradient_reversal.defvjp(_grl_fwd, _grl_bwd)


class GradientReversal:
    """Mirror of the PyTorch module: holds the (non-trainable) scale."""

    def __init__(self, scale: float):
        self.scale = jnp.asarray(scale, dtype=jnp.float32)

    def __call__(self, x):
        return gradient_reversal(x, self.scale)


# ----------------------------------- demo -----------------------------------

if __name__ == "__main__":
    layer = GradientReversal(scale=0.5)

    # 1) Small NCHW input (PyTorch module convention): forward identity; the
    #    backward takes the tiny-gradient fused-XLA path (by design).
    x = jax.random.normal(jax.random.PRNGKey(0), (2, 4, 16, 16), dtype=jnp.float32)
    y = jax.block_until_ready(layer(x))
    assert y.shape == x.shape and y.dtype == x.dtype
    assert jnp.allclose(y, x), "forward must be identity"
    g = jax.block_until_ready(jax.grad(lambda a: jnp.sum(layer(a)))(x))
    assert jnp.allclose(g, -0.5 * jnp.ones_like(x)), "backward must be -scale * grad"

    # 2) f32 gradient large enough for the Pallas kernel path (lane=1024, 2 tiles).
    kf32, kbf16 = jax.random.split(jax.random.PRNGKey(0))
    x_big = jax.random.normal(kf32, (8, 16, 32, 256), dtype=jnp.float32)
    assert _plan(x_big.shape, x_big.dtype) is not None
    g_big = jax.block_until_ready(jax.grad(lambda a: jnp.sum(layer(a)))(x_big))
    assert g_big.shape == x_big.shape and g_big.dtype == x_big.dtype
    assert jnp.allclose(g_big, -0.5 * jnp.ones_like(x_big)), \
        "backward must be -scale * grad (f32 kernel path)"

    # 3) bf16 gradient on the Pallas kernel path (16-row granularity, f32 SMEM scale).
    x_bf = jax.random.normal(kbf16, (4, 16, 32, 256), dtype=jnp.bfloat16)
    assert _plan(x_bf.shape, x_bf.dtype) is not None
    g_bf = jax.block_until_ready(
        jax.grad(lambda a: jnp.sum(layer(a).astype(jnp.float32)))(x_bf))
    assert g_bf.shape == x_bf.shape and g_bf.dtype == x_bf.dtype
    assert jnp.allclose(g_bf.astype(jnp.float32),
                        -0.5 * jnp.ones(x_bf.shape, jnp.float32)), \
        "backward must be -scale * grad (bf16 kernel path)"

    # 4) Awkward shape: no pad/slice passes anymore — fused XLA fallback.
    x_odd = jax.random.normal(jax.random.PRNGKey(1), (2, 3, 17, 19), dtype=jnp.bfloat16)
    assert _plan(x_odd.shape, x_odd.dtype) is None
    g_odd = jax.block_until_ready(
        jax.grad(lambda a: jnp.sum(layer(a).astype(jnp.float32)))(x_odd))
    assert g_odd.shape == x_odd.shape and g_odd.dtype == x_odd.dtype
    assert jnp.allclose(g_odd.astype(jnp.float32),
                        -0.5 * jnp.ones(x_odd.shape, jnp.float32)), \
        "backward must be -scale * grad (fallback path)"

    print("KERNEL_OK")
</pallas_src>

<mosaic_0001>
module attributes {stable_mosaic.version = 11 : i64} {
  func.func @_neg_scale_kernel(%arg0: i32, %arg1: memref<1xf32, #tpu.memory_space<smem>>, %arg2: memref<512x1024xf32, #tpu.memory_space<vmem>>, %arg3: memref<512x1024xf32, #tpu.memory_space<vmem>>) attributes {dimension_semantics = [#tpu.dimension_semantics<parallel>], iteration_bounds = array<i64: 2>, scalar_prefetch = 0 : i64, scratch_operands = 0 : i64, tpu.core_type = #tpu.core_type<tc>, window_params = [{transform_indices = @transform_0, window_bounds = array<i64: 1>}, {transform_indices = @transform_1, window_bounds = array<i64: 512, 1024>}, {transform_indices = @transform_2, window_bounds = array<i64: 512, 1024>}]} {
    %c0 = arith.constant 0 : index
    %0 = memref.load %arg1[%c0] : memref<1xf32, #tpu.memory_space<smem>>
    %c0_0 = arith.constant 0 : index
    %c0_1 = arith.constant 0 : index
    %1 = vector.load %arg2[%c0_0, %c0_1] : memref<512x1024xf32, #tpu.memory_space<vmem>>, vector<512x1024xf32>
    %cst = arith.constant 0.000000e+00 : f32
    %2 = arith.subf %cst, %0 : f32
    %3 = vector.broadcast %2 : f32 to vector<512x1024xf32>
    %4 = arith.mulf %3, %1 : vector<512x1024xf32>
    %c0_2 = arith.constant 0 : index
    %c0_3 = arith.constant 0 : index
    %5 = vector.load %arg3[%c0_2, %c0_3] : memref<512x1024xf32, #tpu.memory_space<vmem>>, vector<512x1024xf32>
    tpu.vector_store %arg3[%c0_2, %c0_3], %4 {strides = array<i32>} : memref<512x1024xf32, #tpu.memory_space<vmem>>, vector<512x1024xf32>,
    return
  }
  func.func @transform_0(%arg0: i32) -> i32 {
    %c0_i32 = arith.constant 0 : i32
    %c0_i32_0 = arith.constant 0 : i32
    return %c0_i32 : i32
  }
  func.func @transform_1(%arg0: i32) -> (i32, i32) {
    %c0_i32 = arith.constant 0 : i32
    %c0_i32_0 = arith.constant 0 : i32
    return %arg0, %c0_i32 : i32, i32
  }
  func.func @transform_2(%arg0: i32) -> (i32, i32) {
    %c0_i32 = arith.constant 0 : i32
    %c0_i32_0 = arith.constant 0 : i32
    return %arg0, %c0_i32 : i32, i32
  }
}

</mosaic_0001>

<bundles_post_ra>
// kernel: tpu_custom_call.1
= control target key start
LH: loop header
LB: loop body
LE: loop exit
PB: predicated region body
PF: predicated region fallthrough
CT: control target
= control target key end

     0   :  { %s3657_s0 = inlined_call_operand.<no memory space> [shape: f32[1], index: 0, kind: input, shape index: {}]   ;;  %s3658_s1 = inlined_call_operand.hbm [shape: f32[1024,1024], index: 1, kind: input, shape index: {}, may-alias: {1,2}]   ;;  %s3659_s2 = inlined_call_operand.hbm [shape: f32[1024,1024], index: 2, kind: output, shape index: {}, may-alias: {1,2}]  }
   0x1   :  { %7 = sst [smem:[#allocation2]] %s3657_s0 }
   0x2   :  { %8 = vsyncpa [#allocation4], 0 }
   0x3   :  { %10 = vsyncpa [#allocation4 + $0x1], 0 }
   0x4   :  { %11 = vsyncpa [#allocation5], 0 }
   0x5   :  { %13 = vsyncpa [#allocation5 + $0x1], 0  ;;  %s1987_s11 = smov 0   ;;  %s1989_s12 = smov 0  }
   0x6   :  { %s1991_s13 = smov 0   ;;  %s1993_s14 = smov 0  }
   0x7 LB: > { %s2008_s0 = sadd.s32 4294967295, %s1963_s14   ;;  %s1797_s15 = sadd.s32 4294967294, %s1963_s14   ;;  %s1963_s14 = sphi %s1993_s14, %s3669_s14   ;;  %s1959_s13 = sphi %s1991_s13, %s3668_s13   ;;  %s1955_s12 = sphi %s1989_s12, %s3667_s12   ;;  %s1951_s11 = sphi %s1987_s11, %s3666_s11  }
   0x8   : > { %s2012_s16 = sadd.s32 1, %s1963_s14   ;;  %s47_s17 = sadd.s32 1, %s1959_s13 }
   0x9   : > { %s44_s18 = ssub.s32 %s1963_s14, %s2012_s16  ;;  %p54_p0 = scmp.ne.s32.totalorder %s1959_s13, %s1955_s12 }
   0xa   : > { %p45_p1 = scmp.eq.s32.totalorder %s44_s18, 0  ;;  %p55_p2 = scmp.eq.s32.totalorder %s1963_s14, 0 }
   0xb   : > { %p60_p3 = scmp.ne.s32.totalorder %s1955_s12, %s1951_s11  ;;  %p61_p4 = scmp.eq.s32.totalorder %s2008_s0, 0 }
   0xc   : > { %s2024_s19 = scalar_select %p45_p1, %s1959_s13, %s47_s17  }
   0xd   : > { %p2026_p5 = por %p55_p2, %p54_p0  ;;  %p2030_p6 = por %p61_p4, %p60_p3 }
   0xe   : > { %p84_p7 = scmp.eq.s32.totalorder %s2008_s0, 1  ;;  %p90_p8 = scmp.eq.s32.totalorder %s1797_s15, 1 }
   0xf   : > { %p1829_p10 = scmp.lt.s32.totalorder %s1963_s14, 2  ;;  %s113_s24 = sand.u32 1, %s1959_s13  }
  0x10   : > { %p2037_p11 = por %p84_p7, %p54_p0  ;;  %p2041_p12 = por %p90_p8, %p60_p3 }
  0x11   : > { %s1814_s25 = sshll.u32 %s1963_s14, 12  ;;  %s1800_s26 = sshll.u32 %s113_s24, 12 }
  0x12   : > { %s123_s29 = scalar_lea.hbm %s3658_s1, %s1814_s25  ;;  %s117_s3 = scalar_lea.vmem [#allocation3], %s1800_s26 }
  0x13   : > { %s124_s30 = sshll.u32 %s123_s29, 4  ;;  %s126_s4 = sshll.u32 %s117_s3, 4  ;;  %s125_s30 = int_to_ptr.hbm [resolvable:$true] %s124_s30  ;;  %s127_s4 = int_to_ptr.vmem [resolvable:$true] %s126_s4 }
  0x14   : > { %p2052_p13 = pnand %p1829_p10, %p2026_p5  ;;  %p1804_p0 = scmp.ge.s32.totalorder %s1963_s14, 1 }
  0x15   : > { %p134_p1 = scmp.lt.s32.totalorder %s1963_s14, 3  ;;  %s114_s6 = scalar_lea.sflag [#allocation4], %s113_s24 }
  0x16   : > { %s1867_s7 = sshra.s32 %s125_s30, 4  ;;  %p1871_p3 = pneg %p2052_p13  ;;  %s1868_s7 = int_to_ptr.hbm [resolvable:$true] %s1867_s7 }
  0x17   : > { %s1869_s8 = scalar_lea.hbm %s1868_s7, 4096  ;;  %s1874_s15 = scalar_lea.hbm %s3658_s1, 8192 }
  0x18   : > { %p1870_p2 = scmp.ne.s32.totalorder %s1868_s7, %s1869_s8  ;;  %p1875_p5 = scmp.lt.s32.totalorder %s1868_s7, %s3658_s1 }
  0x19   : > { %p1876_p8 = scmp.lt.s32.totalorder %s1874_s15, %s1869_s8 }
  0x1a   : > { %p1872_p4 = pnand %p1871_p3, %p1870_p2 }
  0x1b   : > { %p1877_p10 = por %p1876_p8, %p1875_p5 }
  0x1c   : > { %p1873_p7 = pneg %p1872_p4 }
  0x1e   : > { %p1878_p9 = pnand %p1877_p10, %p1873_p7 }
  0x20   : > { %1881 = shalt.err (!%p1878_p9)
}
  0x21   : > { %s1965_s20 = smov 1024   ;;  %s1966_s24 = smov 64  }
  0x22   : > { %1824 = dma.hbm_to_vmem [thread:$0]  (!%p2052_p13), %s125_s30, 65536, %s127_s4, %s114_s6, %s1965_s20, %s1965_s20, %s1966_s24  }
  0x23   : > { %p135_p2 = pnand %p1804_p0, %p134_p1 }
  0x24   : > { %s2073_s25 = sand.u32 (!%p135_p2), 1, %s1955_s12  }
  0x25   : > { %138 = sbr.rel (%p135_p2) target bundleno = 569 (0x239), region = 28  ;;  %s1805_s26 = sshll.u32 (!%p135_p2), %s2073_s25, 12 }
  0x26   : > { %s141_s27 = scalar_lea.sflag (!%p135_p2), [#allocation4], %s2073_s25  ;;  %s2077_s28 = scalar_lea.vmem (!%p135_p2), [#allocation3], %s1805_s26 }
  0x2a   : > { %1942 = dma.done.wait (%p2030_p6), %s141_s27, 65536  }
  0x2b   : > { %1944 = vsyncadd (%p2030_p6), %s141_s27, 4294901760  ;;  %s168_s29 = sld [smem:[#allocation2]]  ;;  %v169_v0 = vld [vmem:[%s2077_s28] sm:$0xff]  ;;  %v170_v1 = vld [vmem:[%s2077_s28 + $0x8] sm:$0xff]  ;;  %s2096_s21 = scalar_lea.vmem [#allocation6], %s1805_s26 }
  0x2c   : > { %v171_v2 = vld [vmem:[%s2077_s28 + $0x10] sm:$0xff]  ;;  %v172_v3 = vld [vmem:[%s2077_s28 + $0x18] sm:$0xff]  ;;  %v173_v5 = vld [vmem:[%s2077_s28 + $0x20] sm:$0xff]  ;;  %s1816_s3 = sshll.u32 %s2008_s0, 12  ;;  %s1721_s6 = sshll.u32 %s2096_s21, 4  ;;  %s1722_s6 = int_to_ptr.vmem [resolvable:$true] %s1721_s6 }
  0x2d   : > { %v174_v9 = vld [vmem:[%s2077_s28 + $0x28] sm:$0xff]  ;;  %v175_v11 = vld [vmem:[%s2077_s28 + $0x30] sm:$0xff]  ;;  %v176_v13 = vld [vmem:[%s2077_s28 + $0x38] sm:$0xff]  ;;  %s1720_s0 = scalar_lea.hbm %s3659_s2, %s1816_s3  ;;  %s1708_s8 = scalar_lea.sflag [#allocation5], %s2073_s25 }
  0x2e   : > { %v177_v15 = vld [vmem:[%s2077_s28 + $0x40] sm:$0xff]  ;;  %v178_v17 = vld [vmem:[%s2077_s28 + $0x48] sm:$0xff]  ;;  %v179_v19 = vld [vmem:[%s2077_s28 + $0x50] sm:$0xff]  ;;  %s1723_s7 = sshll.u32 %s1720_s0, 4  ;;  %s1917_s18 = scalar_lea.hbm %s3659_s2, 8192  ;;  %s1724_s7 = int_to_ptr.hbm [resolvable:$true] %s1723_s7 }
  0x2f   : > { %v180_v21 = vld [vmem:[%s2077_s28 + $0x58] sm:$0xff]  ;;  %v181_v23 = vld [vmem:[%s2077_s28 + $0x60] sm:$0xff]  ;;  %v182_v25 = vld [vmem:[%s2077_s28 + $0x68] sm:$0xff]  ;;  %s1911_s9 = sshra.s32 %s1724_s7, 4  ;;  %s1912_s9 = int_to_ptr.hbm [resolvable:$true] %s1911_s9 }
  0x30   : > { %v183_v27 = vld [vmem:[%s2077_s28 + $0x70] sm:$0xff]  ;;  %v184_v29 = vld [vmem:[%s2077_s28 + $0x78] sm:$0xff]  ;;  %v185_v31 = vld [vmem:[%s2077_s28 + $0x80] sm:$0xff]  ;;  %s1913_s10 = scalar_lea.hbm %s1912_s9, 4096  ;;  %p1918_p0 = scmp.lt.s32.totalorder %s1912_s9, %s3659_s2 }
  0x31   : > { %s681_s30 = ssub.f32 0.0, %s168_s29  ;;  %v186_v33 = vld [vmem:[%s2077_s28 + $0x88] sm:$0xff]  ;;  %v187_v35 = vld [vmem:[%s2077_s28 + $0x90] sm:$0xff]  ;;  %v188_v37 = vld [vmem:[%s2077_s28 + $0x98] sm:$0xff]  ;;  %p1914_p6 = scmp.ne.s32.totalorder %s1912_s9, %s1913_s10 }
  0x32   : > { %v189_v39 = vld [vmem:[%s2077_s28 + $0xa0] sm:$0xff]  ;;  %v190_v41 = vld [vmem:[%s2077_s28 + $0xa8] sm:$0xff]  ;;  %v191_v43 = vld [vmem:[%s2077_s28 + $0xb0] sm:$0xff]  ;;  %p1919_p1 = scmp.lt.s32.totalorder %s1917_s18, %s1913_s10 }
  0x33   : > { %v2087_v4 = vstv %s681_s30  ;;  %v192_v45 = vld [vmem:[%s2077_s28 + $0xb8] sm:$0xff]  ;;  %v193_v47 = vld [vmem:[%s2077_s28 + $0xc0] sm:$0xff]  ;;  %v194_v49 = vld [vmem:[%s2077_s28 + $0xc8] sm:$0xff]  ;;  %p1915_p9 = pnand %p1914_p6, %p2037_p11 }
  0x34   : > { %v683_v6 = vmul.f32 %v2087_v4, %v169_v0  ;;  %v684_v7 = vmul.f32 %v2087_v4, %v170_v1  ;;  %v685_v8 = vmul.f32 %v2087_v4, %v171_v2  ;;  %v686_v10 = vmul.f32 %v2087_v4, %v172_v3  ;;  %v195_v51 = vld [vmem:[%s2077_s28 + $0xd0] sm:$0xff]  ;;  %v196_v53 = vld [vmem:[%s2077_s28 + $0xd8] sm:$0xff]  ;;  %v197_v55 = vld [vmem:[%s2077_s28 + $0xe0] sm:$0xff]  ;;  %p1920_p3 = por %p1919_p1, %p1918_p0 }
  0x35   : > { %v687_v12 = vmul.f32 %v2087_v4, %v173_v5  ;;  %v688_v14 = vmul.f32 %v2087_v4, %v174_v9  ;;  %v689_v16 = vmul.f32 %v2087_v4, %v175_v11  ;;  %v690_v18 = vmul.f32 %v2087_v4, %v176_v13  ;;  %v198_v57 = vld [vmem:[%s2077_s28 + $0xe8] sm:$0xff]  ;;  %v199_v59 = vld [vmem:[%s2077_s28 + $0xf0] sm:$0xff]  ;;  %v200_v61 = vld [vmem:[%s2077_s28 + $0xf8] sm:$0xff]  ;;  %p1916_p13 = pneg %p1915_p9 }
  0x36   : > { %1195 = vst [vmem:[%s2096_s21] sm:$0xff] %v683_v6  ;;  %v691_v20 = vmul.f32 %v2087_v4, %v177_v15  ;;  %v692_v22 = vmul.f32 %v2087_v4, %v178_v17  ;;  %v693_v24 = vmul.f32 %v2087_v4, %v179_v19  ;;  %v694_v26 = vmul.f32 %v2087_v4, %v180_v21  ;;  %v201_v63 = vld [vmem:[%s2077_s28 + $0x100] sm:$0xff]  ;;  %v202_v1 = vld [vmem:[%s2077_s28 + $0x108] sm:$0xff]  ;;  %v203_v3 = vld [vmem:[%s2077_s28 + $0x110] sm:$0xff] }
  0x37   : > { %1196 = vst [vmem:[%s2096_s21 + $0x8] sm:$0xff] %v684_v7  ;;  %v695_v28 = vmul.f32 %v2087_v4, %v181_v23  ;;  %v696_v30 = vmul.f32 %v2087_v4, %v182_v25  ;;  %v697_v32 = vmul.f32 %v2087_v4, %v183_v27  ;;  %v698_v34 = vmul.f32 %v2087_v4, %v184_v29  ;;  %v204_v6 = vld [vmem:[%s2077_s28 + $0x118] sm:$0xff]  ;;  %p1921_p4 = pnand %p1920_p3, %p1916_p13 }
  0x38   : > { %1197 = vst [vmem:[%s2096_s21 + $0x10] sm:$0xff] %v685_v8  ;;  %v699_v36 = vmul.f32 %v2087_v4, %v185_v31  ;;  %v700_v38 = vmul.f32 %v2087_v4, %v186_v33  ;;  %v701_v40 = vmul.f32 %v2087_v4, %v187_v35  ;;  %v702_v42 = vmul.f32 %v2087_v4, %v188_v37  ;;  %v205_v8 = vld [vmem:[%s2077_s28 + $0x120] sm:$0xff] }
  0x39   : > { %1198 = vst [vmem:[%s2096_s21 + $0x18] sm:$0xff] %v686_v10  ;;  %v703_v44 = vmul.f32 %v2087_v4, %v189_v39  ;;  %v704_v46 = vmul.f32 %v2087_v4, %v190_v41  ;;  %v705_v48 = vmul.f32 %v2087_v4, %v191_v43  ;;  %v706_v50 = vmul.f32 %v2087_v4, %v192_v45  ;;  %v206_v10 = vld [vmem:[%s2077_s28 + $0x128] sm:$0xff] }
  0x3a   : > { %1199 = vst [vmem:[%s2096_s21 + $0x20] sm:$0xff] %v687_v12  ;;  %v707_v52 = vmul.f32 %v2087_v4, %v193_v47  ;;  %v708_v54 = vmul.f32 %v2087_v4, %v194_v49  ;;  %v709_v56 = vmul.f32 %v2087_v4, %v195_v51  ;;  %v710_v58 = vmul.f32 %v2087_v4, %v196_v53  ;;  %v207_v12 = vld [vmem:[%s2077_s28 + $0x130] sm:$0xff] }
  0x3b   : > { %1200 = vst [vmem:[%s2096_s21 + $0x28] sm:$0xff] %v688_v14  ;;  %v711_v60 = vmul.f32 %v2087_v4, %v197_v55  ;;  %v712_v62 = vmul.f32 %v2087_v4, %v198_v57  ;;  %v713_v0 = vmul.f32 %v2087_v4, %v199_v59  ;;  %v714_v2 = vmul.f32 %v2087_v4, %v200_v61  ;;  %v208_v14 = vld [vmem:[%s2077_s28 + $0x138] sm:$0xff] }
  0x3c   : > { %1201 = vst [vmem:[%s2096_s21 + $0x30] sm:$0xff] %v689_v16  ;;  %v715_v5 = vmul.f32 %v2087_v4, %v201_v63  ;;  %v716_v7 = vmul.f32 %v2087_v4, %v202_v1  ;;  %v717_v9 = vmul.f32 %v2087_v4, %v203_v3  ;;  %v718_v11 = vmul.f32 %v2087_v4, %v204_v6  ;;  %v209_v16 = vld [vmem:[%s2077_s28 + $0x140] sm:$0xff] }
  0x3d   : > { %1202 = vst [vmem:[%s2096_s21 + $0x38] sm:$0xff] %v690_v18  ;;  %v719_v13 = vmul.f32 %v2087_v4, %v205_v8  ;;  %v720_v15 = vmul.f32 %v2087_v4, %v206_v10  ;;  %v721_v17 = vmul.f32 %v2087_v4, %v207_v12  ;;  %v210_v18 = vld [vmem:[%s2077_s28 + $0x148] sm:$0xff]  ;;  %v722_v19 = vmul.f32 %v2087_v4, %v208_v14 }
  0x3e   : > { %1203 = vst [vmem:[%s2096_s21 + $0x40] sm:$0xff] %v691_v20  ;;  %v211_v20 = vld [vmem:[%s2077_s28 + $0x150] sm:$0xff]  ;;  %v723_v21 = vmul.f32 %v2087_v4, %v209_v16  ;;  %v724_v23 = vmul.f32 %v2087_v4, %v210_v18 }
  0x3f   : > { %1204 = vst [vmem:[%s2096_s21 + $0x48] sm:$0xff] %v692_v22  ;;  %v212_v22 = vld [vmem:[%s2077_s28 + $0x158] sm:$0xff]  ;;  %v725_v25 = vmul.f32 %v2087_v4, %v211_v20 }
  0x40   : > { %1205 = vst [vmem:[%s2096_s21 + $0x50] sm:$0xff] %v693_v24  ;;  %v213_v24 = vld [vmem:[%s2077_s28 + $0x160] sm:$0xff]  ;;  %v726_v27 = vmul.f32 %v2087_v4, %v212_v22 }
  0x41   : > { %1206 = vst [vmem:[%s2096_s21 + $0x58] sm:$0xff] %v694_v26  ;;  %v214_v26 = vld [vmem:[%s2077_s28 + $0x168] sm:$0xff]  ;;  %v727_v29 = vmul.f32 %v2087_v4, %v213_v24 }
  0x42   : > { %1207 = vst [vmem:[%s2096_s21 + $0x60] sm:$0xff] %v695_v28  ;;  %v215_v28 = vld [vmem:[%s2077_s28 + $0x170] sm:$0xff]  ;;  %v728_v31 = vmul.f32 %v2087_v4, %v214_v26 }
  0x43   : > { %1208 = vst [vmem:[%s2096_s21 + $0x68] sm:$0xff] %v696_v30  ;;  %v216_v30 = vld [vmem:[%s2077_s28 + $0x178] sm:$0xff]  ;;  %v729_v33 = vmul.f32 %v2087_v4, %v215_v28 }
  0x44   : > { %1209 = vst [vmem:[%s2096_s21 + $0x70] sm:$0xff] %v697_v32  ;;  %v217_v32 = vld [vmem:[%s2077_s28 + $0x180] sm:$0xff]  ;;  %v730_v35 = vmul.f32 %v2087_v4, %v216_v30 }
  0x45   : > { %1210 = vst [vmem:[%s2096_s21 + $0x78] sm:$0xff] %v698_v34  ;;  %v218_v34 = vld [vmem:[%s2077_s28 + $0x188] sm:$0xff]  ;;  %v731_v37 = vmul.f32 %v2087_v4, %v217_v32 }
  0x46   : > { %1211 = vst [vmem:[%s2096_s21 + $0x80] sm:$0xff] %v699_v36  ;;  %v219_v36 = vld [vmem:[%s2077_s28 + $0x190] sm:$0xff]  ;;  %v732_v39 = vmul.f32 %v2087_v4, %v218_v34 }
  0x47   : > { %1212 = vst [vmem:[%s2096_s21 + $0x88] sm:$0xff] %v700_v38  ;;  %v220_v38 = vld [vmem:[%s2077_s28 + $0x198] sm:$0xff]  ;;  %v733_v41 = vmul.f32 %v2087_v4, %v219_v36 }
  0x48   : > { %1213 = vst [vmem:[%s2096_s21 + $0x90] sm:$0xff] %v701_v40  ;;  %v221_v40 = vld [vmem:[%s2077_s28 + $0x1a0] sm:$0xff]  ;;  %v734_v43 = vmul.f32 %v2087_v4, %v220_v38 }
  0x49   : > { %1214 = vst [vmem:[%s2096_s21 + $0x98] sm:$0xff] %v702_v42  ;;  %v222_v42 = vld [vmem:[%s2077_s28 + $0x1a8] sm:$0xff]  ;;  %v735_v45 = vmul.f32 %v2087_v4, %v221_v40 }
  0x4a   : > { %1215 = vst [vmem:[%s2096_s21 + $0xa0] sm:$0xff] %v703_v44  ;;  %v223_v44 = vld [vmem:[%s2077_s28 + $0x1b0] sm:$0xff]  ;;  %v736_v47 = vmul.f32 %v2087_v4, %v222_v42 }
  0x4b   : > { %1216 = vst [vmem:[%s2096_s21 + $0xa8] sm:$0xff] %v704_v46  ;;  %v224_v46 = vld [vmem:[%s2077_s28 + $0x1b8] sm:$0xff]  ;;  %v737_v49 = vmul.f32 %v2087_v4, %v223_v44 }
  0x4c   : > { %1217 = vst [vmem:[%s2096_s21 + $0xb0] sm:$0xff] %v705_v48  ;;  %v225_v48 = vld [vmem:[%s2077_s28 + $0x1c0] sm:$0xff]  ;;  %v738_v51 = vmul.f32 %v2087_v4, %v224_v46 }
  0x4d   : > { %1218 = vst [vmem:[%s2096_s21 + $0xb8] sm:$0xff] %v706_v50  ;;  %v226_v50 = vld [vmem:[%s2077_s28 + $0x1c8] sm:$0xff]  ;;  %v739_v53 = vmul.f32 %v2087_v4, %v225_v48 }
  0x4e   : > { %1219 = vst [vmem:[%s2096_s21 + $0xc0] sm:$0xff] %v707_v52  ;;  %v227_v52 = vld [vmem:[%s2077_s28 + $0x1d0] sm:$0xff]  ;;  %v740_v55 = vmul.f32 %v2087_v4, %v226_v50 }
  0x4f   : > { %1220 = vst [vmem:[%s2096_s21 + $0xc8] sm:$0xff] %v708_v54  ;;  %v228_v54 = vld [vmem:[%s2077_s28 + $0x1d8] sm:$0xff]  ;;  %v741_v57 = vmul.f32 %v2087_v4, %v227_v52 }
  0x50   : > { %1221 = vst [vmem:[%s2096_s21 + $0xd0] sm:$0xff] %v709_v56  ;;  %v229_v56 = vld [vmem:[%s2077_s28 + $0x1e0] sm:$0xff]  ;;  %v742_v59 = vmul.f32 %v2087_v4, %v228_v54 }
  0x51   : > { %1222 = vst [vmem:[%s2096_s21 + $0xd8] sm:$0xff] %v710_v58  ;;  %v230_v58 = vld [vmem:[%s2077_s28 + $0x1e8] sm:$0xff]  ;;  %v743_v61 = vmul.f32 %v2087_v4, %v229_v56 }
  0x52   : > { %1223 = vst [vmem:[%s2096_s21 + $0xe0] sm:$0xff] %v711_v60  ;;  %v231_v60 = vld [vmem:[%s2077_s28 + $0x1f0] sm:$0xff]  ;;  %v744_v63 = vmul.f32 %v2087_v4, %v230_v58 }
  0x53   : > { %1224 = vst [vmem:[%s2096_s21 + $0xe8] sm:$0xff] %v712_v62  ;;  %v232_v62 = vld [vmem:[%s2077_s28 + $0x1f8] sm:$0xff]  ;;  %v745_v1 = vmul.f32 %v2087_v4, %v231_v60 }
  0x54   : > { %1225 = vst [vmem:[%s2096_s21 + $0xf0] sm:$0xff] %v713_v0  ;;  %v233_v0 = vld [vmem:[%s2077_s28 + $0x200] sm:$0xff]  ;;  %v746_v3 = vmul.f32 %v2087_v4, %v232_v62 }
  0x55   : > { %1226 = vst [vmem:[%s2096_s21 + $0xf8] sm:$0xff] %v714_v2  ;;  %v234_v2 = vld [vmem:[%s2077_s28 + $0x208] sm:$0xff]  ;;  %v747_v6 = vmul.f32 %v2087_v4, %v233_v0 }
  0x56   : > { %1227 = vst [vmem:[%s2096_s21 + $0x100] sm:$0xff] %v715_v5  ;;  %v235_v5 = vld [vmem:[%s2077_s28 + $0x210] sm:$0xff]  ;;  %v748_v8 = vmul.f32 %v2087_v4, %v234_v2 }
  0x57   : > { %1228 = vst [vmem:[%s2096_s21 + $0x108] sm:$0xff] %v716_v7  ;;  %v236_v7 = vld [vmem:[%s2077_s28 + $0x218] sm:$0xff]  ;;  %v749_v10 = vmul.f32 %v2087_v4, %v235_v5 }
  0x58   : > { %1229 = vst [vmem:[%s2096_s21 + $0x110] sm:$0xff] %v717_v9  ;;  %v237_v9 = vld [vmem:[%s2077_s28 + $0x220] sm:$0xff]  ;;  %v750_v12 = vmul.f32 %v2087_v4, %v236_v7 }
  0x59   : > { %1230 = vst [vmem:[%s2096_s21 + $0x118] sm:$0xff] %v718_v11  ;;  %v238_v11 = vld [vmem:[%s2077_s28 + $0x228] sm:$0xff]  ;;  %v751_v14 = vmul.f32 %v2087_v4, %v237_v9 }
  0x5a   : > { %1231 = vst [vmem:[%s2096_s21 + $0x120] sm:$0xff] %v719_v13  ;;  %v239_v13 = vld [vmem:[%s2077_s28 + $0x230] sm:$0xff]  ;;  %v752_v16 = vmul.f32 %v2087_v4, %v238_v11 }
  0x5b   : > { %1232 = vst [vmem:[%s2096_s21 + $0x128] sm:$0xff] %v720_v15  ;;  %v240_v15 = vld [vmem:[%s2077_s28 + $0x238] sm:$0xff]  ;;  %v753_v18 = vmul.f32 %v2087_v4, %v239_v13 }
  0x5c   : > { %1233 = vst [vmem:[%s2096_s21 + $0x130] sm:$0xff] %v721_v17  ;;  %v241_v17 = vld [vmem:[%s2077_s28 + $0x240] sm:$0xff]  ;;  %v754_v20 = vmul.f32 %v2087_v4, %v240_v15 }
  0x5d   : > { %1234 = vst [vmem:[%s2096_s21 + $0x138] sm:$0xff] %v722_v19  ;;  %v242_v19 = vld [vmem:[%s2077_s28 + $0x248] sm:$0xff]  ;;  %v755_v22 = vmul.f32 %v2087_v4, %v241_v17 }
  0x5e   : > { %1235 = vst [vmem:[%s2096_s21 + $0x140] sm:$0xff] %v723_v21  ;;  %v243_v21 = vld [vmem:[%s2077_s28 + $0x250] sm:$0xff]  ;;  %v756_v24 = vmul.f32 %v2087_v4, %v242_v19 }
  0x5f   : > { %1236 = vst [vmem:[%s2096_s21 + $0x148] sm:$0xff] %v724_v23  ;;  %v244_v23 = vld [vmem:[%s2077_s28 + $0x258] sm:$0xff]  ;;  %v757_v26 = vmul.f32 %v2087_v4, %v243_v21 }
  0x60   : > { %1237 = vst [vmem:[%s2096_s21 + $0x150] sm:$0xff] %v725_v25  ;;  %v245_v25 = vld [vmem:[%s2077_s28 + $0x260] sm:$0xff]  ;;  %v758_v28 = vmul.f32 %v2087_v4, %v244_v23 }
  0x61   : > { %1238 = vst [vmem:[%s2096_s21 + $0x158] sm:$0xff] %v726_v27  ;;  %v246_v27 = vld [vmem:[%s2077_s28 + $0x268] sm:$0xff]  ;;  %v759_v30 = vmul.f32 %v2087_v4, %v245_v25 }
  0x62   : > { %1239 = vst [vmem:[%s2096_s21 + $0x160] sm:$0xff] %v727_v29  ;;  %v247_v29 = vld [vmem:[%s2077_s28 + $0x270] sm:$0xff]  ;;  %v760_v32 = vmul.f32 %v2087_v4, %v246_v27 }
  0x63   : > { %1240 = vst [vmem:[%s2096_s21 + $0x168] sm:$0xff] %v728_v31  ;;  %v248_v31 = vld [vmem:[%s2077_s28 + $0x278] sm:$0xff]  ;;  %v761_v34 = vmul.f32 %v2087_v4, %v247_v29 }
  0x64   : > { %1241 = vst [vmem:[%s2096_s21 + $0x170] sm:$0xff] %v729_v33  ;;  %v249_v33 = vld [vmem:[%s2077_s28 + $0x280] sm:$0xff]  ;;  %v762_v36 = vmul.f32 %v2087_v4, %v248_v31 }
  0x65   : > { %1242 = vst [vmem:[%s2096_s21 + $0x178] sm:$0xff] %v730_v35  ;;  %v250_v35 = vld [vmem:[%s2077_s28 + $0x288] sm:$0xff]  ;;  %v763_v38 = vmul.f32 %v2087_v4, %v249_v33 }
  0x66   : > { %1243 = vst [vmem:[%s2096_s21 + $0x180] sm:$0xff] %v731_v37  ;;  %v251_v37 = vld [vmem:[%s2077_s28 + $0x290] sm:$0xff]  ;;  %v764_v40 = vmul.f32 %v2087_v4, %v250_v35 }
  0x67   : > { %1244 = vst [vmem:[%s2096_s21 + $0x188] sm:$0xff] %v732_v39  ;;  %v252_v39 = vld [vmem:[%s2077_s28 + $0x298] sm:$0xff]  ;;  %v765_v42 = vmul.f32 %v2087_v4, %v251_v37 }
  0x68   : > { %1245 = vst [vmem:[%s2096_s21 + $0x190] sm:$0xff] %v733_v41  ;;  %v253_v41 = vld [vmem:[%s2077_s28 + $0x2a0] sm:$0xff]  ;;  %v766_v44 = vmul.f32 %v2087_v4, %v252_v39 }
  0x69   : > { %1246 = vst [vmem:[%s2096_s21 + $0x198] sm:$0xff] %v734_v43  ;;  %v254_v43 = vld [vmem:[%s2077_s28 + $0x2a8] sm:$0xff]  ;;  %v767_v46 = vmul.f32 %v2087_v4, %v253_v41 }
  0x6a   : > { %1247 = vst [vmem:[%s2096_s21 + $0x1a0] sm:$0xff] %v735_v45  ;;  %v255_v45 = vld [vmem:[%s2077_s28 + $0x2b0] sm:$0xff]  ;;  %v768_v48 = vmul.f32 %v2087_v4, %v254_v43 }
  0x6b   : > { %1248 = vst [vmem:[%s2096_s21 + $0x1a8] sm:$0xff] %v736_v47  ;;  %v256_v47 = vld [vmem:[%s2077_s28 + $0x2b8] sm:$0xff]  ;;  %v769_v50 = vmul.f32 %v2087_v4, %v255_v45 }
  0x6c   : > { %1249 = vst [vmem:[%s2096_s21 + $0x1b0] sm:$0xff] %v737_v49  ;;  %v257_v49 = vld [vmem:[%s2077_s28 + $0x2c0] sm:$0xff]  ;;  %v770_v52 = vmul.f32 %v2087_v4, %v256_v47 }
  0x6d   : > { %1250 = vst [vmem:[%s2096_s21 + $0x1b8] sm:$0xff] %v738_v51  ;;  %v258_v51 = vld [vmem:[%s2077_s28 + $0x2c8] sm:$0xff]  ;;  %v771_v54 = vmul.f32 %v2087_v4, %v257_v49 }
  0x6e   : > { %1251 = vst [vmem:[%s2096_s21 + $0x1c0] sm:$0xff] %v739_v53  ;;  %v259_v53 = vld [vmem:[%s2077_s28 + $0x2d0] sm:$0xff]  ;;  %v772_v56 = vmul.f32 %v2087_v4, %v258_v51 }
  0x6f   : > { %1252 = vst [vmem:[%s2096_s21 + $0x1c8] sm:$0xff] %v740_v55  ;;  %v260_v55 = vld [vmem:[%s2077_s28 + $0x2d8] sm:$0xff]  ;;  %v773_v58 = vmul.f32 %v2087_v4, %v259_v53 }
  0x70   : > { %1253 = vst [vmem:[%s2096_s21 + $0x1d0] sm:$0xff] %v741_v57  ;;  %v261_v57 = vld [vmem:[%s2077_s28 + $0x2e0] sm:$0xff]  ;;  %v774_v60 = vmul.f32 %v2087_v4, %v260_v55 }
  0x71   : > { %1254 = vst [vmem:[%s2096_s21 + $0x1d8] sm:$0xff] %v742_v59  ;;  %v262_v59 = vld [vmem:[%s2077_s28 + $0x2e8] sm:$0xff]  ;;  %v775_v62 = vmul.f32 %v2087_v4, %v261_v57 }
  0x72   : > { %1255 = vst [vmem:[%s2096_s21 + $0x1e0] sm:$0xff] %v743_v61  ;;  %v263_v61 = vld [vmem:[%s2077_s28 + $0x2f0] sm:$0xff]  ;;  %v776_v0 = vmul.f32 %v2087_v4, %v262_v59 }
  0x73   : > { %1256 = vst [vmem:[%s2096_s21 + $0x1e8] sm:$0xff] %v744_v63  ;;  %v264_v63 = vld [vmem:[%s2077_s28 + $0x2f8] sm:$0xff]  ;;  %v777_v2 = vmul.f32 %v2087_v4, %v263_v61 }
  0x74   : > { %1257 = vst [vmem:[%s2096_s21 + $0x1f0] sm:$0xff] %v745_v1  ;;  %v265_v1 = vld [vmem:[%s2077_s28 + $0x300] sm:$0xff]  ;;  %v778_v5 = vmul.f32 %v2087_v4, %v264_v63 }
  0x75   : > { %1258 = vst [vmem:[%s2096_s21 + $0x1f8] sm:$0xff] %v746_v3  ;;  %v266_v3 = vld [vmem:[%s2077_s28 + $0x308] sm:$0xff]  ;;  %v779_v7 = vmul.f32 %v2087_v4, %v265_v1 }
  0x76   : > { %1259 = vst [vmem:[%s2096_s21 + $0x200] sm:$0xff] %v747_v6  ;;  %v267_v6 = vld [vmem:[%s2077_s28 + $0x310] sm:$0xff]  ;;  %v780_v9 = vmul.f32 %v2087_v4, %v266_v3 }
  0x77   : > { %1260 = vst [vmem:[%s2096_s21 + $0x208] sm:$0xff] %v748_v8  ;;  %v268_v8 = vld [vmem:[%s2077_s28 + $0x318] sm:$0xff]  ;;  %v781_v11 = vmul.f32 %v2087_v4, %v267_v6 }
  0x78   : > { %1261 = vst [vmem:[%s2096_s21 + $0x210] sm:$0xff] %v749_v10  ;;  %v269_v10 = vld [vmem:[%s2077_s28 + $0x320] sm:$0xff]  ;;  %v782_v13 = vmul.f32 %v2087_v4, %v268_v8 }
  0x79   : > { %1262 = vst [vmem:[%s2096_s21 + $0x218] sm:$0xff] %v750_v12  ;;  %v270_v12 = vld [vmem:[%s2077_s28 + $0x328] sm:$0xff]  ;;  %v783_v15 = vmul.f32 %v2087_v4, %v269_v10 }
  0x7a   : > { %1263 = vst [vmem:[%s2096_s21 + $0x220] sm:$0xff] %v751_v14  ;;  %v271_v14 = vld [vmem:[%s2077_s28 + $0x330] sm:$0xff]  ;;  %v784_v17 = vmul.f32 %v2087_v4, %v270_v12 }
  0x7b   : > { %1264 = vst [vmem:[%s2096_s21 + $0x228] sm:$0xff] %v752_v16  ;;  %v272_v16 = vld [vmem:[%s2077_s28 + $0x338] sm:$0xff]  ;;  %v785_v19 = vmul.f32 %v2087_v4, %v271_v14 }
  0x7c   : > { %1265 = vst [vmem:[%s2096_s21 + $0x230] sm:$0xff] %v753_v18  ;;  %v273_v18 = vld [vmem:[%s2077_s28 + $0x340] sm:$0xff]  ;;  %v786_v21 = vmul.f32 %v2087_v4, %v272_v16 }
  0x7d   : > { %1266 = vst [vmem:[%s2096_s21 + $0x238] sm:$0xff] %v754_v20  ;;  %v274_v20 = vld [vmem:[%s2077_s28 + $0x348] sm:$0xff]  ;;  %v787_v23 = vmul.f32 %v2087_v4, %v273_v18 }
  0x7e   : > { %1267 = vst [vmem:[%s2096_s21 + $0x240] sm:$0xff] %v755_v22  ;;  %v275_v22 = vld [vmem:[%s2077_s28 + $0x350] sm:$0xff]  ;;  %v788_v25 = vmul.f32 %v2087_v4, %v274_v20 }
  0x7f   : > { %1268 = vst [vmem:[%s2096_s21 + $0x248] sm:$0xff] %v756_v24  ;;  %v276_v24 = vld [vmem:[%s2077_s28 + $0x358] sm:$0xff]  ;;  %v789_v27 = vmul.f32 %v2087_v4, %v275_v22 }
  0x80   : > { %1269 = vst [vmem:[%s2096_s21 + $0x250] sm:$0xff] %v757_v26  ;;  %v277_v26 = vld [vmem:[%s2077_s28 + $0x360] sm:$0xff]  ;;  %v790_v29 = vmul.f32 %v2087_v4, %v276_v24 }
  0x81   : > { %1270 = vst [vmem:[%s2096_s21 + $0x258] sm:$0xff] %v758_v28  ;;  %v278_v28 = vld [vmem:[%s2077_s28 + $0x368] sm:$0xff]  ;;  %v791_v31 = vmul.f32 %v2087_v4, %v277_v26 }
  0x82   : > { %1271 = vst [vmem:[%s2096_s21 + $0x260] sm:$0xff] %v759_v30  ;;  %v279_v30 = vld [vmem:[%s2077_s28 + $0x370] sm:$0xff]  ;;  %v792_v33 = vmul.f32 %v2087_v4, %v278_v28 }
  0x83   : > { %1272 = vst [vmem:[%s2096_s21 + $0x268] sm:$0xff] %v760_v32  ;;  %v280_v32 = vld [vmem:[%s2077_s28 + $0x378] sm:$0xff]  ;;  %v793_v35 = vmul.f32 %v2087_v4, %v279_v30 }
  0x84   : > { %1273 = vst [vmem:[%s2096_s21 + $0x270] sm:$0xff] %v761_v34  ;;  %v281_v34 = vld [vmem:[%s2077_s28 + $0x380] sm:$0xff]  ;;  %v794_v37 = vmul.f32 %v2087_v4, %v280_v32 }
  0x85   : > { %1274 = vst [vmem:[%s2096_s21 + $0x278] sm:$0xff] %v762_v36  ;;  %v282_v36 = vld [vmem:[%s2077_s28 + $0x388] sm:$0xff]  ;;  %v795_v39 = vmul.f32 %v2087_v4, %v281_v34 }
  0x86   : > { %1275 = vst [vmem:[%s2096_s21 + $0x280] sm:$0xff] %v763_v38  ;;  %v283_v38 = vld [vmem:[%s2077_s28 + $0x390] sm:$0xff]  ;;  %v796_v41 = vmul.f32 %v2087_v4, %v282_v36 }
  0x87   : > { %1276 = vst [vmem:[%s2096_s21 + $0x288] sm:$0xff] %v764_v40  ;;  %v284_v40 = vld [vmem:[%s2077_s28 + $0x398] sm:$0xff]  ;;  %v797_v43 = vmul.f32 %v2087_v4, %v283_v38 }
  0x88   : > { %1277 = vst [vmem:[%s2096_s21 + $0x290] sm:$0xff] %v765_v42  ;;  %v285_v42 = vld [vmem:[%s2077_s28 + $0x3a0] sm:$0xff]  ;;  %v798_v45 = vmul.f32 %v2087_v4, %v284_v40 }
  0x89   : > { %1278 = vst [vmem:[%s2096_s21 + $0x298] sm:$0xff] %v766_v44  ;;  %v286_v44 = vld [vmem:[%s2077_s28 + $0x3a8] sm:$0xff]  ;;  %v799_v47 = vmul.f32 %v2087_v4, %v285_v42 }
  0x8a   : > { %1279 = vst [vmem:[%s2096_s21 + $0x2a0] sm:$0xff] %v767_v46  ;;  %v287_v46 = vld [vmem:[%s2077_s28 + $0x3b0] sm:$0xff]  ;;  %v800_v49 = vmul.f32 %v2087_v4, %v286_v44 }
  0x8b   : > { %1280 = vst [vmem:[%s2096_s21 + $0x2a8] sm:$0xff] %v768_v48  ;;  %v288_v48 = vld [vmem:[%s2077_s28 + $0x3b8] sm:$0xff]  ;;  %v801_v51 = vmul.f32 %v2087_v4, %v287_v46 }
  0x8c   : > { %1281 = vst [vmem:[%s2096_s21 + $0x2b0] sm:$0xff] %v769_v50  ;;  %v289_v50 = vld [vmem:[%s2077_s28 + $0x3c0] sm:$0xff]  ;;  %v802_v53 = vmul.f32 %v2087_v4, %v288_v48 }
  0x8d   : > { %1282 = vst [vmem:[%s2096_s21 + $0x2b8] sm:$0xff] %v770_v52  ;;  %v290_v52 = vld [vmem:[%s2077_s28 + $0x3c8] sm:$0xff]  ;;  %v803_v55 = vmul.f32 %v2087_v4, %v289_v50 }
  0x8e   : > { %1283 = vst [vmem:[%s2096_s21 + $0x2c0] sm:$0xff] %v771_v54  ;;  %v291_v54 = vld [vmem:[%s2077_s28 + $0x3d0] sm:$0xff]  ;;  %v804_v57 = vmul.f32 %v2087_v4, %v290_v52 }
  0x8f   : > { %1284 = vst [vmem:[%s2096_s21 + $0x2c8] sm:$0xff] %v772_v56  ;;  %v292_v56 = vld [vmem:[%s2077_s28 + $0x3d8] sm:$0xff]  ;;  %v805_v59 = vmul.f32 %v2087_v4, %v291_v54 }
  0x90   : > { %1285 = vst [vmem:[%s2096_s21 + $0x2d0] sm:$0xff] %v773_v58  ;;  %v293_v58 = vld [vmem:[%s2077_s28 + $0x3e0] sm:$0xff]  ;;  %v806_v61 = vmul.f32 %v2087_v4, %v292_v56 }
  0x91   : > { %1286 = vst [vmem:[%s2096_s21 + $0x2d8] sm:$0xff] %v774_v60  ;;  %v294_v60 = vld [vmem:[%s2077_s28 + $0x3e8] sm:$0xff]  ;;  %v807_v63 = vmul.f32 %v2087_v4, %v293_v58 }
  0x92   : > { %1287 = vst [vmem:[%s2096_s21 + $0x2e0] sm:$0xff] %v775_v62  ;;  %v295_v62 = vld [vmem:[%s2077_s28 + $0x3f0] sm:$0xff]  ;;  %v808_v1 = vmul.f32 %v2087_v4, %v294_v60 }
  0x93   : > { %1288 = vst [vmem:[%s2096_s21 + $0x2e8] sm:$0xff] %v776_v0  ;;  %v296_v0 = vld [vmem:[%s2077_s28 + $0x3f8] sm:$0xff]  ;;  %v809_v3 = vmul.f32 %v2087_v4, %v295_v62 }
  0x94   : > { %1289 = vst [vmem:[%s2096_s21 + $0x2f0] sm:$0xff] %v777_v2  ;;  %v297_v2 = vld [vmem:[%s2077_s28 + $0x400] sm:$0xff]  ;;  %v810_v6 = vmul.f32 %v2087_v4, %v296_v0 }
  0x95   : > { %1290 = vst [vmem:[%s2096_s21 + $0x2f8] sm:$0xff] %v778_v5  ;;  %v298_v5 = vld [vmem:[%s2077_s28 + $0x408] sm:$0xff]  ;;  %v811_v8 = vmul.f32 %v2087_v4, %v297_v2 }
  0x96   : > { %1291 = vst [vmem:[%s2096_s21 + $0x300] sm:$0xff] %v779_v7  ;;  %v299_v7 = vld [vmem:[%s2077_s28 + $0x410] sm:$0xff]  ;;  %v812_v10 = vmul.f32 %v2087_v4, %v298_v5 }
  0x97   : > { %1292 = vst [vmem:[%s2096_s21 + $0x308] sm:$0xff] %v780_v9  ;;  %v300_v9 = vld [vmem:[%s2077_s28 + $0x418] sm:$0xff]  ;;  %v813_v12 = vmul.f32 %v2087_v4, %v299_v7 }
  0x98   : > { %1293 = vst [vmem:[%s2096_s21 + $0x310] sm:$0xff] %v781_v11  ;;  %v301_v11 = vld [vmem:[%s2077_s28 + $0x420] sm:$0xff]  ;;  %v814_v14 = vmul.f32 %v2087_v4, %v300_v9 }
  0x99   : > { %1294 = vst [vmem:[%s2096_s21 + $0x318] sm:$0xff] %v782_v13  ;;  %v302_v13 = vld [vmem:[%s2077_s28 + $0x428] sm:$0xff]  ;;  %v815_v16 = vmul.f32 %v2087_v4, %v301_v11 }
  0x9a   : > { %1295 = vst [vmem:[%s2096_s21 + $0x320] sm:$0xff] %v783_v15  ;;  %v303_v15 = vld [vmem:[%s2077_s28 + $0x430] sm:$0xff]  ;;  %v816_v18 = vmul.f32 %v2087_v4, %v302_v13 }
  0x9b   : > { %1296 = vst [vmem:[%s2096_s21 + $0x328] sm:$0xff] %v784_v17  ;;  %v304_v17 = vld [vmem:[%s2077_s28 + $0x438] sm:$0xff]  ;;  %v817_v20 = vmul.f32 %v2087_v4, %v303_v15 }
  0x9c   : > { %1297 = vst [vmem:[%s2096_s21 + $0x330] sm:$0xff] %v785_v19  ;;  %v305_v19 = vld [vmem:[%s2077_s28 + $0x440] sm:$0xff]  ;;  %v818_v22 = vmul.f32 %v2087_v4, %v304_v17 }
  0x9d   : > { %1298 = vst [vmem:[%s2096_s21 + $0x338] sm:$0xff] %v786_v21  ;;  %v306_v21 = vld [vmem:[%s2077_s28 + $0x448] sm:$0xff]  ;;  %v819_v24 = vmul.f32 %v2087_v4, %v305_v19 }
  0x9e   : > { %1299 = vst [vmem:[%s2096_s21 + $0x340] sm:$0xff] %v787_v23  ;;  %v307_v23 = vld [vmem:[%s2077_s28 + $0x450] sm:$0xff]  ;;  %v820_v26 = vmul.f32 %v2087_v4, %v306_v21 }
  0x9f   : > { %1300 = vst [vmem:[%s2096_s21 + $0x348] sm:$0xff] %v788_v25  ;;  %v308_v25 = vld [vmem:[%s2077_s28 + $0x458] sm:$0xff]  ;;  %v821_v28 = vmul.f32 %v2087_v4, %v307_v23 }
  0xa0   : > { %1301 = vst [vmem:[%s2096_s21 + $0x350] sm:$0xff] %v789_v27  ;;  %v309_v27 = vld [vmem:[%s2077_s28 + $0x460] sm:$0xff]  ;;  %v822_v30 = vmul.f32 %v2087_v4, %v308_v25 }
  0xa1   : > { %1302 = vst [vmem:[%s2096_s21 + $0x358] sm:$0xff] %v790_v29  ;;  %v310_v29 = vld [vmem:[%s2077_s28 + $0x468] sm:$0xff]  ;;  %v823_v32 = vmul.f32 %v2087_v4, %v309_v27 }
  0xa2   : > { %1303 = vst [vmem:[%s2096_s21 + $0x360] sm:$0xff] %v791_v31  ;;  %v311_v31 = vld [vmem:[%s2077_s28 + $0x470] sm:$0xff]  ;;  %v824_v34 = vmul.f32 %v2087_v4, %v310_v29 }
  0xa3   : > { %1304 = vst [vmem:[%s2096_s21 + $0x368] sm:$0xff] %v792_v33  ;;  %v312_v33 = vld [vmem:[%s2077_s28 + $0x478] sm:$0xff]  ;;  %v825_v36 = vmul.f32 %v2087_v4, %v311_v31 }
  0xa4   : > { %1305 = vst [vmem:[%s2096_s21 + $0x370] sm:$0xff] %v793_v35  ;;  %v313_v35 = vld [vmem:[%s2077_s28 + $0x480] sm:$0xff]  ;;  %v826_v38 = vmul.f32 %v2087_v4, %v312_v33 }
  0xa5   : > { %1306 = vst [vmem:[%s2096_s21 + $0x378] sm:$0xff] %v794_v37  ;;  %v314_v37 = vld [vmem:[%s2077_s28 + $0x488] sm:$0xff]  ;;  %v827_v40 = vmul.f32 %v2087_v4, %v313_v35 }
  0xa6   : > { %1307 = vst [vmem:[%s2096_s21 + $0x380] sm:$0xff] %v795_v39  ;;  %v315_v39 = vld [vmem:[%s2077_s28 + $0x490] sm:$0xff]  ;;  %v828_v42 = vmul.f32 %v2087_v4, %v314_v37 }
  0xa7   : > { %1308 = vst [vmem:[%s2096_s21 + $0x388] sm:$0xff] %v796_v41  ;;  %v316_v41 = vld [vmem:[%s2077_s28 + $0x498] sm:$0xff]  ;;  %v829_v44 = vmul.f32 %v2087_v4, %v315_v39 }
  0xa8   : > { %1309 = vst [vmem:[%s2096_s21 + $0x390] sm:$0xff] %v797_v43  ;;  %v317_v43 = vld [vmem:[%s2077_s28 + $0x4a0] sm:$0xff]  ;;  %v830_v46 = vmul.f32 %v2087_v4, %v316_v41 }
  0xa9   : > { %1310 = vst [vmem:[%s2096_s21 + $0x398] sm:$0xff] %v798_v45  ;;  %v318_v45 = vld [vmem:[%s2077_s28 + $0x4a8] sm:$0xff]  ;;  %v831_v48 = vmul.f32 %v2087_v4, %v317_v43 }
  0xaa   : > { %1311 = vst [vmem:[%s2096_s21 + $0x3a0] sm:$0xff] %v799_v47  ;;  %v319_v47 = vld [vmem:[%s2077_s28 + $0x4b0] sm:$0xff]  ;;  %v832_v50 = vmul.f32 %v2087_v4, %v318_v45 }
  0xab   : > { %1312 = vst [vmem:[%s2096_s21 + $0x3a8] sm:$0xff] %v800_v49  ;;  %v320_v49 = vld [vmem:[%s2077_s28 + $0x4b8] sm:$0xff]  ;;  %v833_v52 = vmul.f32 %v2087_v4, %v319_v47 }
  0xac   : > { %1313 = vst [vmem:[%s2096_s21 + $0x3b0] sm:$0xff] %v801_v51  ;;  %v321_v51 = vld [vmem:[%s2077_s28 + $0x4c0] sm:$0xff]  ;;  %v834_v54 = vmul.f32 %v2087_v4, %v320_v49 }
  0xad   : > { %1314 = vst [vmem:[%s2096_s21 + $0x3b8] sm:$0xff] %v802_v53  ;;  %v322_v53 = vld [vmem:[%s2077_s28 + $0x4c8] sm:$0xff]  ;;  %v835_v56 = vmul.f32 %v2087_v4, %v321_v51 }
  0xae   : > { %1315 = vst [vmem:[%s2096_s21 + $0x3c0] sm:$0xff] %v803_v55  ;;  %v323_v55 = vld [vmem:[%s2077_s28 + $0x4d0] sm:$0xff]  ;;  %v836_v58 = vmul.f32 %v2087_v4, %v322_v53 }
  0xaf   : > { %1316 = vst [vmem:[%s2096_s21 + $0x3c8] sm:$0xff] %v804_v57  ;;  %v324_v57 = vld [vmem:[%s2077_s28 + $0x4d8] sm:$0xff]  ;;  %v837_v60 = vmul.f32 %v2087_v4, %v323_v55 }
  0xb0   : > { %1317 = vst [vmem:[%s2096_s21 + $0x3d0] sm:$0xff] %v805_v59  ;;  %v325_v59 = vld [vmem:[%s2077_s28 + $0x4e0] sm:$0xff]  ;;  %v838_v62 = vmul.f32 %v2087_v4, %v324_v57 }
  0xb1   : > { %1318 = vst [vmem:[%s2096_s21 + $0x3d8] sm:$0xff] %v806_v61  ;;  %v326_v61 = vld [vmem:[%s2077_s28 + $0x4e8] sm:$0xff]  ;;  %v839_v0 = vmul.f32 %v2087_v4, %v325_v59 }
  0xb2   : > { %1319 = vst [vmem:[%s2096_s21 + $0x3e0] sm:$0xff] %v807_v63  ;;  %v327_v63 = vld [vmem:[%s2077_s28 + $0x4f0] sm:$0xff]  ;;  %v840_v2 = vmul.f32 %v2087_v4, %v326_v61 }
  0xb3   : > { %1320 = vst [vmem:[%s2096_s21 + $0x3e8] sm:$0xff] %v808_v1  ;;  %v328_v1 = vld [vmem:[%s2077_s28 + $0x4f8] sm:$0xff]  ;;  %v841_v5 = vmul.f32 %v2087_v4, %v327_v63 }
  0xb4   : > { %1321 = vst [vmem:[%s2096_s21 + $0x3f0] sm:$0xff] %v809_v3  ;;  %v329_v3 = vld [vmem:[%s2077_s28 + $0x500] sm:$0xff]  ;;  %v842_v7 = vmul.f32 %v2087_v4, %v328_v1 }
  0xb5   : > { %1322 = vst [vmem:[%s2096_s21 + $0x3f8] sm:$0xff] %v810_v6  ;;  %v330_v6 = vld [vmem:[%s2077_s28 + $0x508] sm:$0xff]  ;;  %v843_v9 = vmul.f32 %v2087_v4, %v329_v3 }
  0xb6   : > { %1323 = vst [vmem:[%s2096_s21 + $0x400] sm:$0xff] %v811_v8  ;;  %v331_v8 = vld [vmem:[%s2077_s28 + $0x510] sm:$0xff]  ;;  %v844_v11 = vmul.f32 %v2087_v4, %v330_v6 }
  0xb7   : > { %1324 = vst [vmem:[%s2096_s21 + $0x408] sm:$0xff] %v812_v10  ;;  %v332_v10 = vld [vmem:[%s2077_s28 + $0x518] sm:$0xff]  ;;  %v845_v13 = vmul.f32 %v2087_v4, %v331_v8 }
  0xb8   : > { %1325 = vst [vmem:[%s2096_s21 + $0x410] sm:$0xff] %v813_v12  ;;  %v333_v12 = vld [vmem:[%s2077_s28 + $0x520] sm:$0xff]  ;;  %v846_v15 = vmul.f32 %v2087_v4, %v332_v10 }
  0xb9   : > { %1326 = vst [vmem:[%s2096_s21 + $0x418] sm:$0xff] %v814_v14  ;;  %v334_v14 = vld [vmem:[%s2077_s28 + $0x528] sm:$0xff]  ;;  %v847_v17 = vmul.f32 %v2087_v4, %v333_v12 }
  0xba   : > { %1327 = vst [vmem:[%s2096_s21 + $0x420] sm:$0xff] %v815_v16  ;;  %v335_v16 = vld [vmem:[%s2077_s28 + $0x530] sm:$0xff]  ;;  %v848_v19 = vmul.f32 %v2087_v4, %v334_v14 }
  0xbb   : > { %1328 = vst [vmem:[%s2096_s21 + $0x428] sm:$0xff] %v816_v18  ;;  %v336_v18 = vld [vmem:[%s2077_s28 + $0x538] sm:$0xff]  ;;  %v849_v21 = vmul.f32 %v2087_v4, %v335_v16 }
  0xbc   : > { %1329 = vst [vmem:[%s2096_s21 + $0x430] sm:$0xff] %v817_v20  ;;  %v337_v20 = vld [vmem:[%s2077_s28 + $0x540] sm:$0xff]  ;;  %v850_v23 = vmul.f32 %v2087_v4, %v336_v18 }
  0xbd   : > { %1330 = vst [vmem:[%s2096_s21 + $0x438] sm:$0xff] %v818_v22  ;;  %v338_v22 = vld [vmem:[%s2077_s28 + $0x548] sm:$0xff]  ;;  %v851_v25 = vmul.f32 %v2087_v4, %v337_v20 }
  0xbe   : > { %1331 = vst [vmem:[%s2096_s21 + $0x440] sm:$0xff] %v819_v24  ;;  %v339_v24 = vld [vmem:[%s2077_s28 + $0x550] sm:$0xff]  ;;  %v852_v27 = vmul.f32 %v2087_v4, %v338_v22 }
  0xbf   : > { %1332 = vst [vmem:[%s2096_s21 + $0x448] sm:$0xff] %v820_v26  ;;  %v340_v26 = vld [vmem:[%s2077_s28 + $0x558] sm:$0xff]  ;;  %v853_v29 = vmul.f32 %v2087_v4, %v339_v24 }
  0xc0   : > { %1333 = vst [vmem:[%s2096_s21 + $0x450] sm:$0xff] %v821_v28  ;;  %v341_v28 = vld [vmem:[%s2077_s28 + $0x560] sm:$0xff]  ;;  %v854_v31 = vmul.f32 %v2087_v4, %v340_v26 }
  0xc1   : > { %1334 = vst [vmem:[%s2096_s21 + $0x458] sm:$0xff] %v822_v30  ;;  %v342_v30 = vld [vmem:[%s2077_s28 + $0x568] sm:$0xff]  ;;  %v855_v33 = vmul.f32 %v2087_v4, %v341_v28 }
  0xc2   : > { %1335 = vst [vmem:[%s2096_s21 + $0x460] sm:$0xff] %v823_v32  ;;  %v343_v32 = vld [vmem:[%s2077_s28 + $0x570] sm:$0xff]  ;;  %v856_v35 = vmul.f32 %v2087_v4, %v342_v30 }
  0xc3   : > { %1336 = vst [vmem:[%s2096_s21 + $0x468] sm:$0xff] %v824_v34  ;;  %v344_v34 = vld [vmem:[%s2077_s28 + $0x578] sm:$0xff]  ;;  %v857_v37 = vmul.f32 %v2087_v4, %v343_v32 }
  0xc4   : > { %1337 = vst [vmem:[%s2096_s21 + $0x470] sm:$0xff] %v825_v36  ;;  %v345_v36 = vld [vmem:[%s2077_s28 + $0x580] sm:$0xff]  ;;  %v858_v39 = vmul.f32 %v2087_v4, %v344_v34 }
  0xc5   : > { %1338 = vst [vmem:[%s2096_s21 + $0x478] sm:$0xff] %v826_v38  ;;  %v346_v38 = vld [vmem:[%s2077_s28 + $0x588] sm:$0xff]  ;;  %v859_v41 = vmul.f32 %v2087_v4, %v345_v36 }
  0xc6   : > { %1339 = vst [vmem:[%s2096_s21 + $0x480] sm:$0xff] %v827_v40  ;;  %v347_v40 = vld [vmem:[%s2077_s28 + $0x590] sm:$0xff]  ;;  %v860_v43 = vmul.f32 %v2087_v4, %v346_v38 }
  0xc7   : > { %1340 = vst [vmem:[%s2096_s21 + $0x488] sm:$0xff] %v828_v42  ;;  %v348_v42 = vld [vmem:[%s2077_s28 + $0x598] sm:$0xff]  ;;  %v861_v45 = vmul.f32 %v2087_v4, %v347_v40 }
  0xc8   : > { %1341 = vst [vmem:[%s2096_s21 + $0x490] sm:$0xff] %v829_v44  ;;  %v349_v44 = vld [vmem:[%s2077_s28 + $0x5a0] sm:$0xff]  ;;  %v862_v47 = vmul.f32 %v2087_v4, %v348_v42 }
  0xc9   : > { %1342 = vst [vmem:[%s2096_s21 + $0x498] sm:$0xff] %v830_v46  ;;  %v350_v46 = vld [vmem:[%s2077_s28 + $0x5a8] sm:$0xff]  ;;  %v863_v49 = vmul.f32 %v2087_v4, %v349_v44 }
  0xca   : > { %1343 = vst [vmem:[%s2096_s21 + $0x4a0] sm:$0xff] %v831_v48  ;;  %v351_v48 = vld [vmem:[%s2077_s28 + $0x5b0] sm:$0xff]  ;;  %v864_v51 = vmul.f32 %v2087_v4, %v350_v46 }
  0xcb   : > { %1344 = vst [vmem:[%s2096_s21 + $0x4a8] sm:$0xff] %v832_v50  ;;  %v352_v50 = vld [vmem:[%s2077_s28 + $0x5b8] sm:$0xff]  ;;  %v865_v53 = vmul.f32 %v2087_v4, %v351_v48 }
  0xcc   : > { %1345 = vst [vmem:[%s2096_s21 + $0x4b0] sm:$0xff] %v833_v52  ;;  %v353_v52 = vld [vmem:[%s2077_s28 + $0x5c0] sm:$0xff]  ;;  %v866_v55 = vmul.f32 %v2087_v4, %v352_v50 }
  0xcd   : > { %1346 = vst [vmem:[%s2096_s21 + $0x4b8] sm:$0xff] %v834_v54  ;;  %v354_v54 = vld [vmem:[%s2077_s28 + $0x5c8] sm:$0xff]  ;;  %v867_v57 = vmul.f32 %v2087_v4, %v353_v52 }
  0xce   : > { %1347 = vst [vmem:[%s2096_s21 + $0x4c0] sm:$0xff] %v835_v56  ;;  %v355_v56 = vld [vmem:[%s2077_s28 + $0x5d0] sm:$0xff]  ;;  %v868_v59 = vmul.f32 %v2087_v4, %v354_v54 }
  0xcf   : > { %1348 = vst [vmem:[%s2096_s21 + $0x4c8] sm:$0xff] %v836_v58  ;;  %v356_v58 = vld [vmem:[%s2077_s28 + $0x5d8] sm:$0xff]  ;;  %v869_v61 = vmul.f32 %v2087_v4, %v355_v56 }
  0xd0   : > { %1349 = vst [vmem:[%s2096_s21 + $0x4d0] sm:$0xff] %v837_v60  ;;  %v357_v60 = vld [vmem:[%s2077_s28 + $0x5e0] sm:$0xff]  ;;  %v870_v63 = vmul.f32 %v2087_v4, %v356_v58 }
  0xd1   : > { %1350 = vst [vmem:[%s2096_s21 + $0x4d8] sm:$0xff] %v838_v62  ;;  %v358_v62 = vld [vmem:[%s2077_s28 + $0x5e8] sm:$0xff]  ;;  %v871_v1 = vmul.f32 %v2087_v4, %v357_v60 }
  0xd2   : > { %1351 = vst [vmem:[%s2096_s21 + $0x4e0] sm:$0xff] %v839_v0  ;;  %v359_v0 = vld [vmem:[%s2077_s28 + $0x5f0] sm:$0xff]  ;;  %v872_v3 = vmul.f32 %v2087_v4, %v358_v62 }
  0xd3   : > { %1352 = vst [vmem:[%s2096_s21 + $0x4e8] sm:$0xff] %v840_v2  ;;  %v360_v2 = vld [vmem:[%s2077_s28 + $0x5f8] sm:$0xff]  ;;  %v873_v6 = vmul.f32 %v2087_v4, %v359_v0 }
  0xd4   : > { %1353 = vst [vmem:[%s2096_s21 + $0x4f0] sm:$0xff] %v841_v5  ;;  %v361_v5 = vld [vmem:[%s2077_s28 + $0x600] sm:$0xff]  ;;  %v874_v8 = vmul.f32 %v2087_v4, %v360_v2 }
  0xd5   : > { %1354 = vst [vmem:[%s2096_s21 + $0x4f8] sm:$0xff] %v842_v7  ;;  %v362_v7 = vld [vmem:[%s2077_s28 + $0x608] sm:$0xff]  ;;  %v875_v10 = vmul.f32 %v2087_v4, %v361_v5 }
  0xd6   : > { %1355 = vst [vmem:[%s2096_s21 + $0x500] sm:$0xff] %v843_v9  ;;  %v363_v9 = vld [vmem:[%s2077_s28 + $0x610] sm:$0xff]  ;;  %v876_v12 = vmul.f32 %v2087_v4, %v362_v7 }
  0xd7   : > { %1356 = vst [vmem:[%s2096_s21 + $0x508] sm:$0xff] %v844_v11  ;;  %v364_v11 = vld [vmem:[%s2077_s28 + $0x618] sm:$0xff]  ;;  %v877_v14 = vmul.f32 %v2087_v4, %v363_v9 }
  0xd8   : > { %1357 = vst [vmem:[%s2096_s21 + $0x510] sm:$0xff] %v845_v13  ;;  %v365_v13 = vld [vmem:[%s2077_s28 + $0x620] sm:$0xff]  ;;  %v878_v16 = vmul.f32 %v2087_v4, %v364_v11 }
  0xd9   : > { %1358 = vst [vmem:[%s2096_s21 + $0x518] sm:$0xff] %v846_v15  ;;  %v366_v15 = vld [vmem:[%s2077_s28 + $0x628] sm:$0xff]  ;;  %v879_v18 = vmul.f32 %v2087_v4, %v365_v13 }
  0xda   : > { %1359 = vst [vmem:[%s2096_s21 + $0x520] sm:$0xff] %v847_v17  ;;  %v367_v17 = vld [vmem:[%s2077_s28 + $0x630] sm:$0xff]  ;;  %v880_v20 = vmul.f32 %v2087_v4, %v366_v15 }
  0xdb   : > { %1360 = vst [vmem:[%s2096_s21 + $0x528] sm:$0xff] %v848_v19  ;;  %v368_v19 = vld [vmem:[%s2077_s28 + $0x638] sm:$0xff]  ;;  %v881_v22 = vmul.f32 %v2087_v4, %v367_v17 }
  0xdc   : > { %1361 = vst [vmem:[%s2096_s21 + $0x530] sm:$0xff] %v849_v21  ;;  %v369_v21 = vld [vmem:[%s2077_s28 + $0x640] sm:$0xff]  ;;  %v882_v24 = vmul.f32 %v2087_v4, %v368_v19 }
  0xdd   : > { %1362 = vst [vmem:[%s2096_s21 + $0x538] sm:$0xff] %v850_v23  ;;  %v370_v23 = vld [vmem:[%s2077_s28 + $0x648] sm:$0xff]  ;;  %v883_v26 = vmul.f32 %v2087_v4, %v369_v21 }
  0xde   : > { %1363 = vst [vmem:[%s2096_s21 + $0x540] sm:$0xff] %v851_v25  ;;  %v371_v25 = vld [vmem:[%s2077_s28 + $0x650] sm:$0xff]  ;;  %v884_v28 = vmul.f32 %v2087_v4, %v370_v23 }
  0xdf   : > { %1364 = vst [vmem:[%s2096_s21 + $0x548] sm:$0xff] %v852_v27  ;;  %v372_v27 = vld [vmem:[%s2077_s28 + $0x658] sm:$0xff]  ;;  %v885_v30 = vmul.f32 %v2087_v4, %v371_v25 }
  0xe0   : > { %1365 = vst [vmem:[%s2096_s21 + $0x550] sm:$0xff] %v853_v29  ;;  %v373_v29 = vld [vmem:[%s2077_s28 + $0x660] sm:$0xff]  ;;  %v886_v32 = vmul.f32 %v2087_v4, %v372_v27 }
  0xe1   : > { %1366 = vst [vmem:[%s2096_s21 + $0x558] sm:$0xff] %v854_v31  ;;  %v374_v31 = vld [vmem:[%s2077_s28 + $0x668] sm:$0xff]  ;;  %v887_v34 = vmul.f32 %v2087_v4, %v373_v29 }
  0xe2   : > { %1367 = vst [vmem:[%s2096_s21 + $0x560] sm:$0xff] %v855_v33  ;;  %v375_v33 = vld [vmem:[%s2077_s28 + $0x670] sm:$0xff]  ;;  %v888_v36 = vmul.f32 %v2087_v4, %v374_v31 }
  0xe3   : > { %1368 = vst [vmem:[%s2096_s21 + $0x568] sm:$0xff] %v856_v35  ;;  %v376_v35 = vld [vmem:[%s2077_s28 + $0x678] sm:$0xff]  ;;  %v889_v38 = vmul.f32 %v2087_v4, %v375_v33 }
  0xe4   : > { %1369 = vst [vmem:[%s2096_s21 + $0x570] sm:$0xff] %v857_v37  ;;  %v377_v37 = vld [vmem:[%s2077_s28 + $0x680] sm:$0xff]  ;;  %v890_v40 = vmul.f32 %v2087_v4, %v376_v35 }
  0xe5   : > { %1370 = vst [vmem:[%s2096_s21 + $0x578] sm:$0xff] %v858_v39  ;;  %v378_v39 = vld [vmem:[%s2077_s28 + $0x688] sm:$0xff]  ;;  %v891_v42 = vmul.f32 %v2087_v4, %v377_v37 }
  0xe6   : > { %1371 = vst [vmem:[%s2096_s21 + $0x580] sm:$0xff] %v859_v41  ;;  %v379_v41 = vld [vmem:[%s2077_s28 + $0x690] sm:$0xff]  ;;  %v892_v44 = vmul.f32 %v2087_v4, %v378_v39 }
  0xe7   : > { %1372 = vst [vmem:[%s2096_s21 + $0x588] sm:$0xff] %v860_v43  ;;  %v380_v43 = vld [vmem:[%s2077_s28 + $0x698] sm:$0xff]  ;;  %v893_v46 = vmul.f32 %v2087_v4, %v379_v41 }
  0xe8   : > { %1373 = vst [vmem:[%s2096_s21 + $0x590] sm:$0xff] %v861_v45  ;;  %v381_v45 = vld [vmem:[%s2077_s28 + $0x6a0] sm:$0xff]  ;;  %v894_v48 = vmul.f32 %v2087_v4, %v380_v43 }
  0xe9   : > { %1374 = vst [vmem:[%s2096_s21 + $0x598] sm:$0xff] %v862_v47  ;;  %v382_v47 = vld [vmem:[%s2077_s28 + $0x6a8] sm:$0xff]  ;;  %v895_v50 = vmul.f32 %v2087_v4, %v381_v45 }
  0xea   : > { %1375 = vst [vmem:[%s2096_s21 + $0x5a0] sm:$0xff] %v863_v49  ;;  %v383_v49 = vld [vmem:[%s2077_s28 + $0x6b0] sm:$0xff]  ;;  %v896_v52 = vmul.f32 %v2087_v4, %v382_v47 }
  0xeb   : > { %1376 = vst [vmem:[%s2096_s21 + $0x5a8] sm:$0xff] %v864_v51  ;;  %v384_v51 = vld [vmem:[%s2077_s28 + $0x6b8] sm:$0xff]  ;;  %v897_v54 = vmul.f32 %v2087_v4, %v383_v49 }
  0xec   : > { %1377 = vst [vmem:[%s2096_s21 + $0x5b0] sm:$0xff] %v865_v53  ;;  %v385_v53 = vld [vmem:[%s2077_s28 + $0x6c0] sm:$0xff]  ;;  %v898_v56 = vmul.f32 %v2087_v4, %v384_v51 }
  0xed   : > { %1378 = vst [vmem:[%s2096_s21 + $0x5b8] sm:$0xff] %v866_v55  ;;  %v386_v55 = vld [vmem:[%s2077_s28 + $0x6c8] sm:$0xff]  ;;  %v899_v58 = vmul.f32 %v2087_v4, %v385_v53 }
  0xee   : > { %1379 = vst [vmem:[%s2096_s21 + $0x5c0] sm:$0xff] %v867_v57  ;;  %v387_v57 = vld [vmem:[%s2077_s28 + $0x6d0] sm:$0xff]  ;;  %v900_v60 = vmul.f32 %v2087_v4, %v386_v55 }
  0xef   : > { %1380 = vst [vmem:[%s2096_s21 + $0x5c8] sm:$0xff] %v868_v59  ;;  %v388_v59 = vld [vmem:[%s2077_s28 + $0x6d8] sm:$0xff]  ;;  %v901_v62 = vmul.f32 %v2087_v4, %v387_v57 }
  0xf0   : > { %1381 = vst [vmem:[%s2096_s21 + $0x5d0] sm:$0xff] %v869_v61  ;;  %v389_v61 = vld [vmem:[%s2077_s28 + $0x6e0] sm:$0xff]  ;;  %v902_v0 = vmul.f32 %v2087_v4, %v388_v59 }
  0xf1   : > { %1382 = vst [vmem:[%s2096_s21 + $0x5d8] sm:$0xff] %v870_v63  ;;  %v390_v63 = vld [vmem:[%s2077_s28 + $0x6e8] sm:$0xff]  ;;  %v903_v2 = vmul.f32 %v2087_v4, %v389_v61 }
  0xf2   : > { %1383 = vst [vmem:[%s2096_s21 + $0x5e0] sm:$0xff] %v871_v1  ;;  %v391_v1 = vld [vmem:[%s2077_s28 + $0x6f0] sm:$0xff]  ;;  %v904_v5 = vmul.f32 %v2087_v4, %v390_v63 }
  0xf3   : > { %1384 = vst [vmem:[%s2096_s21 + $0x5e8] sm:$0xff] %v872_v3  ;;  %v392_v3 = vld [vmem:[%s2077_s28 + $0x6f8] sm:$0xff]  ;;  %v905_v7 = vmul.f32 %v2087_v4, %v391_v1 }
  0xf4   : > { %1385 = vst [vmem:[%s2096_s21 + $0x5f0] sm:$0xff] %v873_v6  ;;  %v393_v6 = vld [vmem:[%s2077_s28 + $0x700] sm:$0xff]  ;;  %v906_v9 = vmul.f32 %v2087_v4, %v392_v3 }
  0xf5   : > { %1386 = vst [vmem:[%s2096_s21 + $0x5f8] sm:$0xff] %v874_v8  ;;  %v394_v8 = vld [vmem:[%s2077_s28 + $0x708] sm:$0xff]  ;;  %v907_v11 = vmul.f32 %v2087_v4, %v393_v6 }
  0xf6   : > { %1387 = vst [vmem:[%s2096_s21 + $0x600] sm:$0xff] %v875_v10  ;;  %v395_v10 = vld [vmem:[%s2077_s28 + $0x710] sm:$0xff]  ;;  %v908_v13 = vmul.f32 %v2087_v4, %v394_v8 }
  0xf7   : > { %1388 = vst [vmem:[%s2096_s21 + $0x608] sm:$0xff] %v876_v12  ;;  %v396_v12 = vld [vmem:[%s2077_s28 + $0x718] sm:$0xff]  ;;  %v909_v15 = vmul.f32 %v2087_v4, %v395_v10 }
  0xf8   : > { %1389 = vst [vmem:[%s2096_s21 + $0x610] sm:$0xff] %v877_v14  ;;  %v397_v14 = vld [vmem:[%s2077_s28 + $0x720] sm:$0xff]  ;;  %v910_v17 = vmul.f32 %v2087_v4, %v396_v12 }
  0xf9   : > { %1390 = vst [vmem:[%s2096_s21 + $0x618] sm:$0xff] %v878_v16  ;;  %v398_v16 = vld [vmem:[%s2077_s28 + $0x728] sm:$0xff]  ;;  %v911_v19 = vmul.f32 %v2087_v4, %v397_v14 }
  0xfa   : > { %1391 = vst [vmem:[%s2096_s21 + $0x620] sm:$0xff] %v879_v18  ;;  %v399_v18 = vld [vmem:[%s2077_s28 + $0x730] sm:$0xff]  ;;  %v912_v21 = vmul.f32 %v2087_v4, %v398_v16 }
  0xfb   : > { %1392 = vst [vmem:[%s2096_s21 + $0x628] sm:$0xff] %v880_v20  ;;  %v400_v20 = vld [vmem:[%s2077_s28 + $0x738] sm:$0xff]  ;;  %v913_v23 = vmul.f32 %v2087_v4, %v399_v18 }
  0xfc   : > { %1393 = vst [vmem:[%s2096_s21 + $0x630] sm:$0xff] %v881_v22  ;;  %v401_v22 = vld [vmem:[%s2077_s28 + $0x740] sm:$0xff]  ;;  %v914_v25 = vmul.f32 %v2087_v4, %v400_v20 }
  0xfd   : > { %1394 = vst [vmem:[%s2096_s21 + $0x638] sm:$0xff] %v882_v24  ;;  %v402_v24 = vld [vmem:[%s2077_s28 + $0x748] sm:$0xff]  ;;  %v915_v27 = vmul.f32 %v2087_v4, %v401_v22 }
  0xfe   : > { %1395 = vst [vmem:[%s2096_s21 + $0x640] sm:$0xff] %v883_v26  ;;  %v403_v26 = vld [vmem:[%s2077_s28 + $0x750] sm:$0xff]  ;;  %v916_v29 = vmul.f32 %v2087_v4, %v402_v24 }
  0xff   : > { %1396 = vst [vmem:[%s2096_s21 + $0x648] sm:$0xff] %v884_v28  ;;  %v404_v28 = vld [vmem:[%s2077_s28 + $0x758] sm:$0xff]  ;;  %v917_v31 = vmul.f32 %v2087_v4, %v403_v26 }
 0x100   : > { %1397 = vst [vmem:[%s2096_s21 + $0x650] sm:$0xff] %v885_v30  ;;  %v405_v30 = vld [vmem:[%s2077_s28 + $0x760] sm:$0xff]  ;;  %v918_v33 = vmul.f32 %v2087_v4, %v404_v28 }
 0x101   : > { %1398 = vst [vmem:[%s2096_s21 + $0x658] sm:$0xff] %v886_v32  ;;  %v406_v32 = vld [vmem:[%s2077_s28 + $0x768] sm:$0xff]  ;;  %v919_v35 = vmul.f32 %v2087_v4, %v405_v30 }
 0x102   : > { %1399 = vst [vmem:[%s2096_s21 + $0x660] sm:$0xff] %v887_v34  ;;  %v407_v34 = vld [vmem:[%s2077_s28 + $0x770] sm:$0xff]  ;;  %v920_v37 = vmul.f32 %v2087_v4, %v406_v32 }
 0x103   : > { %1400 = vst [vmem:[%s2096_s21 + $0x668] sm:$0xff] %v888_v36  ;;  %v408_v36 = vld [vmem:[%s2077_s28 + $0x778] sm:$0xff]  ;;  %v921_v39 = vmul.f32 %v2087_v4, %v407_v34 }
 0x104   : > { %1401 = vst [vmem:[%s2096_s21 + $0x670] sm:$0xff] %v889_v38  ;;  %v409_v38 = vld [vmem:[%s2077_s28 + $0x780] sm:$0xff]  ;;  %v922_v41 = vmul.f32 %v2087_v4, %v408_v36 }
 0x105   : > { %1402 = vst [vmem:[%s2096_s21 + $0x678] sm:$0xff] %v890_v40  ;;  %v410_v40 = vld [vmem:[%s2077_s28 + $0x788] sm:$0xff]  ;;  %v923_v43 = vmul.f32 %v2087_v4, %v409_v38 }
 0x106   : > { %1403 = vst [vmem:[%s2096_s21 + $0x680] sm:$0xff] %v891_v42  ;;  %v411_v42 = vld [vmem:[%s2077_s28 + $0x790] sm:$0xff]  ;;  %v924_v45 = vmul.f32 %v2087_v4, %v410_v40 }
 0x107   : > { %1404 = vst [vmem:[%s2096_s21 + $0x688] sm:$0xff] %v892_v44  ;;  %v412_v44 = vld [vmem:[%s2077_s28 + $0x798] sm:$0xff]  ;;  %v925_v47 = vmul.f32 %v2087_v4, %v411_v42 }
 0x108   : > { %1405 = vst [vmem:[%s2096_s21 + $0x690] sm:$0xff] %v893_v46  ;;  %v413_v46 = vld [vmem:[%s2077_s28 + $0x7a0] sm:$0xff]  ;;  %v926_v49 = vmul.f32 %v2087_v4, %v412_v44 }
 0x109   : > { %1406 = vst [vmem:[%s2096_s21 + $0x698] sm:$0xff] %v894_v48  ;;  %v414_v48 = vld [vmem:[%s2077_s28 + $0x7a8] sm:$0xff]  ;;  %v927_v51 = vmul.f32 %v2087_v4, %v413_v46 }
 0x10a   : > { %1407 = vst [vmem:[%s2096_s21 + $0x6a0] sm:$0xff] %v895_v50  ;;  %v415_v50 = vld [vmem:[%s2077_s28 + $0x7b0] sm:$0xff]  ;;  %v928_v53 = vmul.f32 %v2087_v4, %v414_v48 }
 0x10b   : > { %1408 = vst [vmem:[%s2096_s21 + $0x6a8] sm:$0xff] %v896_v52  ;;  %v416_v52 = vld [vmem:[%s2077_s28 + $0x7b8] sm:$0xff]  ;;  %v929_v55 = vmul.f32 %v2087_v4, %v415_v50 }
 0x10c   : > { %1409 = vst [vmem:[%s2096_s21 + $0x6b0] sm:$0xff] %v897_v54  ;;  %v417_v54 = vld [vmem:[%s2077_s28 + $0x7c0] sm:$0xff]  ;;  %v930_v57 = vmul.f32 %v2087_v4, %v416_v52 }
 0x10d   : > { %1410 = vst [vmem:[%s2096_s21 + $0x6b8] sm:$0xff] %v898_v56  ;;  %v418_v56 = vld [vmem:[%s2077_s28 + $0x7c8] sm:$0xff]  ;;  %v931_v59 = vmul.f32 %v2087_v4, %v417_v54 }
 0x10e   : > { %1411 = vst [vmem:[%s2096_s21 + $0x6c0] sm:$0xff] %v899_v58  ;;  %v419_v58 = vld [vmem:[%s2077_s28 + $0x7d0] sm:$0xff]  ;;  %v932_v61 = vmul.f32 %v2087_v4, %v418_v56 }
 0x10f   : > { %1412 = vst [vmem:[%s2096_s21 + $0x6c8] sm:$0xff] %v900_v60  ;;  %v420_v60 = vld [vmem:[%s2077_s28 + $0x7d8] sm:$0xff]  ;;  %v933_v63 = vmul.f32 %v2087_v4, %v419_v58 }
 0x110   : > { %1413 = vst [vmem:[%s2096_s21 + $0x6d0] sm:$0xff] %v901_v62  ;;  %v421_v62 = vld [vmem:[%s2077_s28 + $0x7e0] sm:$0xff]  ;;  %v934_v1 = vmul.f32 %v2087_v4, %v420_v60 }
 0x111   : > { %1414 = vst [vmem:[%s2096_s21 + $0x6d8] sm:$0xff] %v902_v0  ;;  %v422_v0 = vld [vmem:[%s2077_s28 + $0x7e8] sm:$0xff]  ;;  %v935_v3 = vmul.f32 %v2087_v4, %v421_v62 }
 0x112   : > { %1415 = vst [vmem:[%s2096_s21 + $0x6e0] sm:$0xff] %v903_v2  ;;  %v423_v2 = vld [vmem:[%s2077_s28 + $0x7f0] sm:$0xff]  ;;  %v936_v6 = vmul.f32 %v2087_v4, %v422_v0 }
 0x113   : > { %1416 = vst [vmem:[%s2096_s21 + $0x6e8] sm:$0xff] %v904_v5  ;;  %v424_v5 = vld [vmem:[%s2077_s28 + $0x7f8] sm:$0xff]  ;;  %v937_v8 = vmul.f32 %v2087_v4, %v423_v2 }
 0x114   : > { %1417 = vst [vmem:[%s2096_s21 + $0x6f0] sm:$0xff] %v905_v7  ;;  %v425_v7 = vld [vmem:[%s2077_s28 + $0x800] sm:$0xff]  ;;  %v938_v10 = vmul.f32 %v2087_v4, %v424_v5 }
 0x115   : > { %1418 = vst [vmem:[%s2096_s21 + $0x6f8] sm:$0xff] %v906_v9  ;;  %v426_v9 = vld [vmem:[%s2077_s28 + $0x808] sm:$0xff]  ;;  %v939_v12 = vmul.f32 %v2087_v4, %v425_v7 }
 0x116   : > { %1419 = vst [vmem:[%s2096_s21 + $0x700] sm:$0xff] %v907_v11  ;;  %v427_v11 = vld [vmem:[%s2077_s28 + $0x810] sm:$0xff]  ;;  %v940_v14 = vmul.f32 %v2087_v4, %v426_v9 }
 0x117   : > { %1420 = vst [vmem:[%s2096_s21 + $0x708] sm:$0xff] %v908_v13  ;;  %v428_v13 = vld [vmem:[%s2077_s28 + $0x818] sm:$0xff]  ;;  %v941_v16 = vmul.f32 %v2087_v4, %v427_v11 }
 0x118   : > { %1421 = vst [vmem:[%s2096_s21 + $0x710] sm:$0xff] %v909_v15  ;;  %v429_v15 = vld [vmem:[%s2077_s28 + $0x820] sm:$0xff]  ;;  %v942_v18 = vmul.f32 %v2087_v4, %v428_v13 }
 0x119   : > { %1422 = vst [vmem:[%s2096_s21 + $0x718] sm:$0xff] %v910_v17  ;;  %v430_v17 = vld [vmem:[%s2077_s28 + $0x828] sm:$0xff]  ;;  %v943_v20 = vmul.f32 %v2087_v4, %v429_v15 }
 0x11a   : > { %1423 = vst [vmem:[%s2096_s21 + $0x720] sm:$0xff] %v911_v19  ;;  %v431_v19 = vld [vmem:[%s2077_s28 + $0x830] sm:$0xff]  ;;  %v944_v22 = vmul.f32 %v2087_v4, %v430_v17 }
 0x11b   : > { %1424 = vst [vmem:[%s2096_s21 + $0x728] sm:$0xff] %v912_v21  ;;  %v432_v21 = vld [vmem:[%s2077_s28 + $0x838] sm:$0xff]  ;;  %v945_v24 = vmul.f32 %v2087_v4, %v431_v19 }
 0x11c   : > { %1425 = vst [vmem:[%s2096_s21 + $0x730] sm:$0xff] %v913_v23  ;;  %v433_v23 = vld [vmem:[%s2077_s28 + $0x840] sm:$0xff]  ;;  %v946_v26 = vmul.f32 %v2087_v4, %v432_v21 }
 0x11d   : > { %1426 = vst [vmem:[%s2096_s21 + $0x738] sm:$0xff] %v914_v25  ;;  %v434_v25 = vld [vmem:[%s2077_s28 + $0x848] sm:$0xff]  ;;  %v947_v28 = vmul.f32 %v2087_v4, %v433_v23 }
 0x11e   : > { %1427 = vst [vmem:[%s2096_s21 + $0x740] sm:$0xff] %v915_v27  ;;  %v435_v27 = vld [vmem:[%s2077_s28 + $0x850] sm:$0xff]  ;;  %v948_v30 = vmul.f32 %v2087_v4, %v434_v25 }
 0x11f   : > { %1428 = vst [vmem:[%s2096_s21 + $0x748] sm:$0xff] %v916_v29  ;;  %v436_v29 = vld [vmem:[%s2077_s28 + $0x858] sm:$0xff]  ;;  %v949_v32 = vmul.f32 %v2087_v4, %v435_v27 }
 0x120   : > { %1429 = vst [vmem:[%s2096_s21 + $0x750] sm:$0xff] %v917_v31  ;;  %v437_v31 = vld [vmem:[%s2077_s28 + $0x860] sm:$0xff]  ;;  %v950_v34 = vmul.f32 %v2087_v4, %v436_v29 }
 0x121   : > { %1430 = vst [vmem:[%s2096_s21 + $0x758] sm:$0xff] %v918_v33  ;;  %v438_v33 = vld [vmem:[%s2077_s28 + $0x868] sm:$0xff]  ;;  %v951_v36 = vmul.f32 %v2087_v4, %v437_v31 }
 0x122   : > { %1431 = vst [vmem:[%s2096_s21 + $0x760] sm:$0xff] %v919_v35  ;;  %v439_v35 = vld [vmem:[%s2077_s28 + $0x870] sm:$0xff]  ;;  %v952_v38 = vmul.f32 %v2087_v4, %v438_v33 }
 0x123   : > { %1432 = vst [vmem:[%s2096_s21 + $0x768] sm:$0xff] %v920_v37  ;;  %v440_v37 = vld [vmem:[%s2077_s28 + $0x878] sm:$0xff]  ;;  %v953_v40 = vmul.f32 %v2087_v4, %v439_v35 }
 0x124   : > { %1433 = vst [vmem:[%s2096_s21 + $0x770] sm:$0xff] %v921_v39  ;;  %v441_v39 = vld [vmem:[%s2077_s28 + $0x880] sm:$0xff]  ;;  %v954_v42 = vmul.f32 %v2087_v4, %v440_v37 }
 0x125   : > { %1434 = vst [vmem:[%s2096_s21 + $0x778] sm:$0xff] %v922_v41  ;;  %v442_v41 = vld [vmem:[%s2077_s28 + $0x888] sm:$0xff]  ;;  %v955_v44 = vmul.f32 %v2087_v4, %v441_v39 }
 0x126   : > { %1435 = vst [vmem:[%s2096_s21 + $0x780] sm:$0xff] %v923_v43  ;;  %v443_v43 = vld [vmem:[%s2077_s28 + $0x890] sm:$0xff]  ;;  %v956_v46 = vmul.f32 %v2087_v4, %v442_v41 }
 0x127   : > { %1436 = vst [vmem:[%s2096_s21 + $0x788] sm:$0xff] %v924_v45  ;;  %v444_v45 = vld [vmem:[%s2077_s28 + $0x898] sm:$0xff]  ;;  %v957_v48 = vmul.f32 %v2087_v4, %v443_v43 }
 0x128   : > { %1437 = vst [vmem:[%s2096_s21 + $0x790] sm:$0xff] %v925_v47  ;;  %v445_v47 = vld [vmem:[%s2077_s28 + $0x8a0] sm:$0xff]  ;;  %v958_v50 = vmul.f32 %v2087_v4, %v444_v45 }
 0x129   : > { %1438 = vst [vmem:[%s2096_s21 + $0x798] sm:$0xff] %v926_v49  ;;  %v446_v49 = vld [vmem:[%s2077_s28 + $0x8a8] sm:$0xff]  ;;  %v959_v52 = vmul.f32 %v2087_v4, %v445_v47 }
 0x12a   : > { %1439 = vst [vmem:[%s2096_s21 + $0x7a0] sm:$0xff] %v927_v51  ;;  %v447_v51 = vld [vmem:[%s2077_s28 + $0x8b0] sm:$0xff]  ;;  %v960_v54 = vmul.f32 %v2087_v4, %v446_v49 }
 0x12b   : > { %1440 = vst [vmem:[%s2096_s21 + $0x7a8] sm:$0xff] %v928_v53  ;;  %v448_v53 = vld [vmem:[%s2077_s28 + $0x8b8] sm:$0xff]  ;;  %v961_v56 = vmul.f32 %v2087_v4, %v447_v51 }
 0x12c   : > { %1441 = vst [vmem:[%s2096_s21 + $0x7b0] sm:$0xff] %v929_v55  ;;  %v449_v55 = vld [vmem:[%s2077_s28 + $0x8c0] sm:$0xff]  ;;  %v962_v58 = vmul.f32 %v2087_v4, %v448_v53 }
 0x12d   : > { %1442 = vst [vmem:[%s2096_s21 + $0x7b8] sm:$0xff] %v930_v57  ;;  %v450_v57 = vld [vmem:[%s2077_s28 + $0x8c8] sm:$0xff]  ;;  %v963_v60 = vmul.f32 %v2087_v4, %v449_v55 }
 0x12e   : > { %1443 = vst [vmem:[%s2096_s21 + $0x7c0] sm:$0xff] %v931_v59  ;;  %v451_v59 = vld [vmem:[%s2077_s28 + $0x8d0] sm:$0xff]  ;;  %v964_v62 = vmul.f32 %v2087_v4, %v450_v57 }
 0x12f   : > { %1444 = vst [vmem:[%s2096_s21 + $0x7c8] sm:$0xff] %v932_v61  ;;  %v452_v61 = vld [vmem:[%s2077_s28 + $0x8d8] sm:$0xff]  ;;  %v965_v0 = vmul.f32 %v2087_v4, %v451_v59 }
 0x130   : > { %1445 = vst [vmem:[%s2096_s21 + $0x7d0] sm:$0xff] %v933_v63  ;;  %v453_v63 = vld [vmem:[%s2077_s28 + $0x8e0] sm:$0xff]  ;;  %v966_v2 = vmul.f32 %v2087_v4, %v452_v61 }
 0x131   : > { %1446 = vst [vmem:[%s2096_s21 + $0x7d8] sm:$0xff] %v934_v1  ;;  %v454_v1 = vld [vmem:[%s2077_s28 + $0x8e8] sm:$0xff]  ;;  %v967_v5 = vmul.f32 %v2087_v4, %v453_v63 }
 0x132   : > { %1447 = vst [vmem:[%s2096_s21 + $0x7e0] sm:$0xff] %v935_v3  ;;  %v455_v3 = vld [vmem:[%s2077_s28 + $0x8f0] sm:$0xff]  ;;  %v968_v7 = vmul.f32 %v2087_v4, %v454_v1 }
 0x133   : > { %1448 = vst [vmem:[%s2096_s21 + $0x7e8] sm:$0xff] %v936_v6  ;;  %v456_v6 = vld [vmem:[%s2077_s28 + $0x8f8] sm:$0xff]  ;;  %v969_v9 = vmul.f32 %v2087_v4, %v455_v3 }
 0x134   : > { %1449 = vst [vmem:[%s2096_s21 + $0x7f0] sm:$0xff] %v937_v8  ;;  %v457_v8 = vld [vmem:[%s2077_s28 + $0x900] sm:$0xff]  ;;  %v970_v11 = vmul.f32 %v2087_v4, %v456_v6 }
 0x135   : > { %1450 = vst [vmem:[%s2096_s21 + $0x7f8] sm:$0xff] %v938_v10  ;;  %v458_v10 = vld [vmem:[%s2077_s28 + $0x908] sm:$0xff]  ;;  %v971_v13 = vmul.f32 %v2087_v4, %v457_v8 }
 0x136   : > { %1451 = vst [vmem:[%s2096_s21 + $0x800] sm:$0xff] %v939_v12  ;;  %v459_v12 = vld [vmem:[%s2077_s28 + $0x910] sm:$0xff]  ;;  %v972_v15 = vmul.f32 %v2087_v4, %v458_v10 }
 0x137   : > { %1452 = vst [vmem:[%s2096_s21 + $0x808] sm:$0xff] %v940_v14  ;;  %v460_v14 = vld [vmem:[%s2077_s28 + $0x918] sm:$0xff]  ;;  %v973_v17 = vmul.f32 %v2087_v4, %v459_v12 }
 0x138   : > { %1453 = vst [vmem:[%s2096_s21 + $0x810] sm:$0xff] %v941_v16  ;;  %v461_v16 = vld [vmem:[%s2077_s28 + $0x920] sm:$0xff]  ;;  %v974_v19 = vmul.f32 %v2087_v4, %v460_v14 }
 0x139   : > { %1454 = vst [vmem:[%s2096_s21 + $0x818] sm:$0xff] %v942_v18  ;;  %v462_v18 = vld [vmem:[%s2077_s28 + $0x928] sm:$0xff]  ;;  %v975_v21 = vmul.f32 %v2087_v4, %v461_v16 }
 0x13a   : > { %1455 = vst [vmem:[%s2096_s21 + $0x820] sm:$0xff] %v943_v20  ;;  %v463_v20 = vld [vmem:[%s2077_s28 + $0x930] sm:$0xff]  ;;  %v976_v23 = vmul.f32 %v2087_v4, %v462_v18 }
 0x13b   : > { %1456 = vst [vmem:[%s2096_s21 + $0x828] sm:$0xff] %v944_v22  ;;  %v464_v22 = vld [vmem:[%s2077_s28 + $0x938] sm:$0xff]  ;;  %v977_v25 = vmul.f32 %v2087_v4, %v463_v20 }
 0x13c   : > { %1457 = vst [vmem:[%s2096_s21 + $0x830] sm:$0xff] %v945_v24  ;;  %v465_v24 = vld [vmem:[%s2077_s28 + $0x940] sm:$0xff]  ;;  %v978_v27 = vmul.f32 %v2087_v4, %v464_v22 }
 0x13d   : > { %1458 = vst [vmem:[%s2096_s21 + $0x838] sm:$0xff] %v946_v26  ;;  %v466_v26 = vld [vmem:[%s2077_s28 + $0x948] sm:$0xff]  ;;  %v979_v29 = vmul.f32 %v2087_v4, %v465_v24 }
 0x13e   : > { %1459 = vst [vmem:[%s2096_s21 + $0x840] sm:$0xff] %v947_v28  ;;  %v467_v28 = vld [vmem:[%s2077_s28 + $0x950] sm:$0xff]  ;;  %v980_v31 = vmul.f32 %v2087_v4, %v466_v26 }
 0x13f   : > { %1460 = vst [vmem:[%s2096_s21 + $0x848] sm:$0xff] %v948_v30  ;;  %v468_v30 = vld [vmem:[%s2077_s28 + $0x958] sm:$0xff]  ;;  %v981_v33 = vmul.f32 %v2087_v4, %v467_v28 }
 0x140   : > { %1461 = vst [vmem:[%s2096_s21 + $0x850] sm:$0xff] %v949_v32  ;;  %v469_v32 = vld [vmem:[%s2077_s28 + $0x960] sm:$0xff]  ;;  %v982_v35 = vmul.f32 %v2087_v4, %v468_v30 }
 0x141   : > { %1462 = vst [vmem:[%s2096_s21 + $0x858] sm:$0xff] %v950_v34  ;;  %v470_v34 = vld [vmem:[%s2077_s28 + $0x968] sm:$0xff]  ;;  %v983_v37 = vmul.f32 %v2087_v4, %v469_v32 }
 0x142   : > { %1463 = vst [vmem:[%s2096_s21 + $0x860] sm:$0xff] %v951_v36  ;;  %v471_v36 = vld [vmem:[%s2077_s28 + $0x970] sm:$0xff]  ;;  %v984_v39 = vmul.f32 %v2087_v4, %v470_v34 }
 0x143   : > { %1464 = vst [vmem:[%s2096_s21 + $0x868] sm:$0xff] %v952_v38  ;;  %v472_v38 = vld [vmem:[%s2077_s28 + $0x978] sm:$0xff]  ;;  %v985_v41 = vmul.f32 %v2087_v4, %v471_v36 }
 0x144   : > { %1465 = vst [vmem:[%s2096_s21 + $0x870] sm:$0xff] %v953_v40  ;;  %v473_v40 = vld [vmem:[%s2077_s28 + $0x980] sm:$0xff]  ;;  %v986_v43 = vmul.f32 %v2087_v4, %v472_v38 }
 0x145   : > { %1466 = vst [vmem:[%s2096_s21 + $0x878] sm:$0xff] %v954_v42  ;;  %v474_v42 = vld [vmem:[%s2077_s28 + $0x988] sm:$0xff]  ;;  %v987_v45 = vmul.f32 %v2087_v4, %v473_v40 }
 0x146   : > { %1467 = vst [vmem:[%s2096_s21 + $0x880] sm:$0xff] %v955_v44  ;;  %v475_v44 = vld [vmem:[%s2077_s28 + $0x990] sm:$0xff]  ;;  %v988_v47 = vmul.f32 %v2087_v4, %v474_v42 }
 0x147   : > { %1468 = vst [vmem:[%s2096_s21 + $0x888] sm:$0xff] %v956_v46  ;;  %v476_v46 = vld [vmem:[%s2077_s28 + $0x998] sm:$0xff]  ;;  %v989_v49 = vmul.f32 %v2087_v4, %v475_v44 }
 0x148   : > { %1469 = vst [vmem:[%s2096_s21 + $0x890] sm:$0xff] %v957_v48  ;;  %v477_v48 = vld [vmem:[%s2077_s28 + $0x9a0] sm:$0xff]  ;;  %v990_v51 = vmul.f32 %v2087_v4, %v476_v46 }
 0x149   : > { %1470 = vst [vmem:[%s2096_s21 + $0x898] sm:$0xff] %v958_v50  ;;  %v478_v50 = vld [vmem:[%s2077_s28 + $0x9a8] sm:$0xff]  ;;  %v991_v53 = vmul.f32 %v2087_v4, %v477_v48 }
 0x14a   : > { %1471 = vst [vmem:[%s2096_s21 + $0x8a0] sm:$0xff] %v959_v52  ;;  %v479_v52 = vld [vmem:[%s2077_s28 + $0x9b0] sm:$0xff]  ;;  %v992_v55 = vmul.f32 %v2087_v4, %v478_v50 }
 0x14b   : > { %1472 = vst [vmem:[%s2096_s21 + $0x8a8] sm:$0xff] %v960_v54  ;;  %v480_v54 = vld [vmem:[%s2077_s28 + $0x9b8] sm:$0xff]  ;;  %v993_v57 = vmul.f32 %v2087_v4, %v479_v52 }
 0x14c   : > { %1473 = vst [vmem:[%s2096_s21 + $0x8b0] sm:$0xff] %v961_v56  ;;  %v481_v56 = vld [vmem:[%s2077_s28 + $0x9c0] sm:$0xff]  ;;  %v994_v59 = vmul.f32 %v2087_v4, %v480_v54 }
 0x14d   : > { %1474 = vst [vmem:[%s2096_s21 + $0x8b8] sm:$0xff] %v962_v58  ;;  %v482_v58 = vld [vmem:[%s2077_s28 + $0x9c8] sm:$0xff]  ;;  %v995_v61 = vmul.f32 %v2087_v4, %v481_v56 }
 0x14e   : > { %1475 = vst [vmem:[%s2096_s21 + $0x8c0] sm:$0xff] %v963_v60  ;;  %v483_v60 = vld [vmem:[%s2077_s28 + $0x9d0] sm:$0xff]  ;;  %v996_v63 = vmul.f32 %v2087_v4, %v482_v58 }
 0x14f   : > { %1476 = vst [vmem:[%s2096_s21 + $0x8c8] sm:$0xff] %v964_v62  ;;  %v484_v62 = vld [vmem:[%s2077_s28 + $0x9d8] sm:$0xff]  ;;  %v997_v1 = vmul.f32 %v2087_v4, %v483_v60 }
 0x150   : > { %1477 = vst [vmem:[%s2096_s21 + $0x8d0] sm:$0xff] %v965_v0  ;;  %v485_v0 = vld [vmem:[%s2077_s28 + $0x9e0] sm:$0xff]  ;;  %v998_v3 = vmul.f32 %v2087_v4, %v484_v62 }
 0x151   : > { %1478 = vst [vmem:[%s2096_s21 + $0x8d8] sm:$0xff] %v966_v2  ;;  %v486_v2 = vld [vmem:[%s2077_s28 + $0x9e8] sm:$0xff]  ;;  %v999_v6 = vmul.f32 %v2087_v4, %v485_v0 }
 0x152   : > { %1479 = vst [vmem:[%s2096_s21 + $0x8e0] sm:$0xff] %v967_v5  ;;  %v487_v5 = vld [vmem:[%s2077_s28 + $0x9f0] sm:$0xff]  ;;  %v1000_v8 = vmul.f32 %v2087_v4, %v486_v2 }
 0x153   : > { %1480 = vst [vmem:[%s2096_s21 + $0x8e8] sm:$0xff] %v968_v7  ;;  %v488_v7 = vld [vmem:[%s2077_s28 + $0x9f8] sm:$0xff]  ;;  %v1001_v10 = vmul.f32 %v2087_v4, %v487_v5 }
 0x154   : > { %1481 = vst [vmem:[%s2096_s21 + $0x8f0] sm:$0xff] %v969_v9  ;;  %v489_v9 = vld [vmem:[%s2077_s28 + $0xa00] sm:$0xff]  ;;  %v1002_v12 = vmul.f32 %v2087_v4, %v488_v7 }
 0x155   : > { %1482 = vst [vmem:[%s2096_s21 + $0x8f8] sm:$0xff] %v970_v11  ;;  %v490_v11 = vld [vmem:[%s2077_s28 + $0xa08] sm:$0xff]  ;;  %v1003_v14 = vmul.f32 %v2087_v4, %v489_v9 }
 0x156   : > { %1483 = vst [vmem:[%s2096_s21 + $0x900] sm:$0xff] %v971_v13  ;;  %v491_v13 = vld [vmem:[%s2077_s28 + $0xa10] sm:$0xff]  ;;  %v1004_v16 = vmul.f32 %v2087_v4, %v490_v11 }
 0x157   : > { %1484 = vst [vmem:[%s2096_s21 + $0x908] sm:$0xff] %v972_v15  ;;  %v492_v15 = vld [vmem:[%s2077_s28 + $0xa18] sm:$0xff]  ;;  %v1005_v18 = vmul.f32 %v2087_v4, %v491_v13 }
 0x158   : > { %1485 = vst [vmem:[%s2096_s21 + $0x910] sm:$0xff] %v973_v17  ;;  %v493_v17 = vld [vmem:[%s2077_s28 + $0xa20] sm:$0xff]  ;;  %v1006_v20 = vmul.f32 %v2087_v4, %v492_v15 }
 0x159   : > { %1486 = vst [vmem:[%s2096_s21 + $0x918] sm:$0xff] %v974_v19  ;;  %v494_v19 = vld [vmem:[%s2077_s28 + $0xa28] sm:$0xff]  ;;  %v1007_v22 = vmul.f32 %v2087_v4, %v493_v17 }
 0x15a   : > { %1487 = vst [vmem:[%s2096_s21 + $0x920] sm:$0xff] %v975_v21  ;;  %v495_v21 = vld [vmem:[%s2077_s28 + $0xa30] sm:$0xff]  ;;  %v1008_v24 = vmul.f32 %v2087_v4, %v494_v19 }
 0x15b   : > { %1488 = vst [vmem:[%s2096_s21 + $0x928] sm:$0xff] %v976_v23  ;;  %v496_v23 = vld [vmem:[%s2077_s28 + $0xa38] sm:$0xff]  ;;  %v1009_v26 = vmul.f32 %v2087_v4, %v495_v21 }
 0x15c   : > { %1489 = vst [vmem:[%s2096_s21 + $0x930] sm:$0xff] %v977_v25  ;;  %v497_v25 = vld [vmem:[%s2077_s28 + $0xa40] sm:$0xff]  ;;  %v1010_v28 = vmul.f32 %v2087_v4, %v496_v23 }
 0x15d   : > { %1490 = vst [vmem:[%s2096_s21 + $0x938] sm:$0xff] %v978_v27  ;;  %v498_v27 = vld [vmem:[%s2077_s28 + $0xa48] sm:$0xff]  ;;  %v1011_v30 = vmul.f32 %v2087_v4, %v497_v25 }
 0x15e   : > { %1491 = vst [vmem:[%s2096_s21 + $0x940] sm:$0xff] %v979_v29  ;;  %v499_v29 = vld [vmem:[%s2077_s28 + $0xa50] sm:$0xff]  ;;  %v1012_v32 = vmul.f32 %v2087_v4, %v498_v27 }
 0x15f   : > { %1492 = vst [vmem:[%s2096_s21 + $0x948] sm:$0xff] %v980_v31  ;;  %v500_v31 = vld [vmem:[%s2077_s28 + $0xa58] sm:$0xff]  ;;  %v1013_v34 = vmul.f32 %v2087_v4, %v499_v29 }
 0x160   : > { %1493 = vst [vmem:[%s2096_s21 + $0x950] sm:$0xff] %v981_v33  ;;  %v501_v33 = vld [vmem:[%s2077_s28 + $0xa60] sm:$0xff]  ;;  %v1014_v36 = vmul.f32 %v2087_v4, %v500_v31 }
 0x161   : > { %1494 = vst [vmem:[%s2096_s21 + $0x958] sm:$0xff] %v982_v35  ;;  %v502_v35 = vld [vmem:[%s2077_s28 + $0xa68] sm:$0xff]  ;;  %v1015_v38 = vmul.f32 %v2087_v4, %v501_v33 }
 0x162   : > { %1495 = vst [vmem:[%s2096_s21 + $0x960] sm:$0xff] %v983_v37  ;;  %v503_v37 = vld [vmem:[%s2077_s28 + $0xa70] sm:$0xff]  ;;  %v1016_v40 = vmul.f32 %v2087_v4, %v502_v35 }
 0x163   : > { %1496 = vst [vmem:[%s2096_s21 + $0x968] sm:$0xff] %v984_v39  ;;  %v504_v39 = vld [vmem:[%s2077_s28 + $0xa78] sm:$0xff]  ;;  %v1017_v42 = vmul.f32 %v2087_v4, %v503_v37 }
 0x164   : > { %1497 = vst [vmem:[%s2096_s21 + $0x970] sm:$0xff] %v985_v41  ;;  %v505_v41 = vld [vmem:[%s2077_s28 + $0xa80] sm:$0xff]  ;;  %v1018_v44 = vmul.f32 %v2087_v4, %v504_v39 }
 0x165   : > { %1498 = vst [vmem:[%s2096_s21 + $0x978] sm:$0xff] %v986_v43  ;;  %v506_v43 = vld [vmem:[%s2077_s28 + $0xa88] sm:$0xff]  ;;  %v1019_v46 = vmul.f32 %v2087_v4, %v505_v41 }
 0x166   : > { %1499 = vst [vmem:[%s2096_s21 + $0x980] sm:$0xff] %v987_v45  ;;  %v507_v45 = vld [vmem:[%s2077_s28 + $0xa90] sm:$0xff]  ;;  %v1020_v48 = vmul.f32 %v2087_v4, %v506_v43 }
 0x167   : > { %1500 = vst [vmem:[%s2096_s21 + $0x988] sm:$0xff] %v988_v47  ;;  %v508_v47 = vld [vmem:[%s2077_s28 + $0xa98] sm:$0xff]  ;;  %v1021_v50 = vmul.f32 %v2087_v4, %v507_v45 }
 0x168   : > { %1501 = vst [vmem:[%s2096_s21 + $0x990] sm:$0xff] %v989_v49  ;;  %v509_v49 = vld [vmem:[%s2077_s28 + $0xaa0] sm:$0xff]  ;;  %v1022_v52 = vmul.f32 %v2087_v4, %v508_v47 }
 0x169   : > { %1502 = vst [vmem:[%s2096_s21 + $0x998] sm:$0xff] %v990_v51  ;;  %v510_v51 = vld [vmem:[%s2077_s28 + $0xaa8] sm:$0xff]  ;;  %v1023_v54 = vmul.f32 %v2087_v4, %v509_v49 }
 0x16a   : > { %1503 = vst [vmem:[%s2096_s21 + $0x9a0] sm:$0xff] %v991_v53  ;;  %v511_v53 = vld [vmem:[%s2077_s28 + $0xab0] sm:$0xff]  ;;  %v1024_v56 = vmul.f32 %v2087_v4, %v510_v51 }
 0x16b   : > { %1504 = vst [vmem:[%s2096_s21 + $0x9a8] sm:$0xff] %v992_v55  ;;  %v512_v55 = vld [vmem:[%s2077_s28 + $0xab8] sm:$0xff]  ;;  %v1025_v58 = vmul.f32 %v2087_v4, %v511_v53 }
 0x16c   : > { %1505 = vst [vmem:[%s2096_s21 + $0x9b0] sm:$0xff] %v993_v57  ;;  %v513_v57 = vld [vmem:[%s2077_s28 + $0xac0] sm:$0xff]  ;;  %v1026_v60 = vmul.f32 %v2087_v4, %v512_v55 }
 0x16d   : > { %1506 = vst [vmem:[%s2096_s21 + $0x9b8] sm:$0xff] %v994_v59  ;;  %v514_v59 = vld [vmem:[%s2077_s28 + $0xac8] sm:$0xff]  ;;  %v1027_v62 = vmul.f32 %v2087_v4, %v513_v57 }
 0x16e   : > { %1507 = vst [vmem:[%s2096_s21 + $0x9c0] sm:$0xff] %v995_v61  ;;  %v515_v61 = vld [vmem:[%s2077_s28 + $0xad0] sm:$0xff]  ;;  %v1028_v0 = vmul.f32 %v2087_v4, %v514_v59 }
 0x16f   : > { %1508 = vst [vmem:[%s2096_s21 + $0x9c8] sm:$0xff] %v996_v63  ;;  %v516_v63 = vld [vmem:[%s2077_s28 + $0xad8] sm:$0xff]  ;;  %v1029_v2 = vmul.f32 %v2087_v4, %v515_v61 }
 0x170   : > { %1509 = vst [vmem:[%s2096_s21 + $0x9d0] sm:$0xff] %v997_v1  ;;  %v517_v1 = vld [vmem:[%s2077_s28 + $0xae0] sm:$0xff]  ;;  %v1030_v5 = vmul.f32 %v2087_v4, %v516_v63 }
 0x171   : > { %1510 = vst [vmem:[%s2096_s21 + $0x9d8] sm:$0xff] %v998_v3  ;;  %v518_v3 = vld [vmem:[%s2077_s28 + $0xae8] sm:$0xff]  ;;  %v1031_v7 = vmul.f32 %v2087_v4, %v517_v1 }
 0x172   : > { %1511 = vst [vmem:[%s2096_s21 + $0x9e0] sm:$0xff] %v999_v6  ;;  %v519_v6 = vld [vmem:[%s2077_s28 + $0xaf0] sm:$0xff]  ;;  %v1032_v9 = vmul.f32 %v2087_v4, %v518_v3 }
 0x173   : > { %1512 = vst [vmem:[%s2096_s21 + $0x9e8] sm:$0xff] %v1000_v8  ;;  %v520_v8 = vld [vmem:[%s2077_s28 + $0xaf8] sm:$0xff]  ;;  %v1033_v11 = vmul.f32 %v2087_v4, %v519_v6 }
 0x174   : > { %1513 = vst [vmem:[%s2096_s21 + $0x9f0] sm:$0xff] %v1001_v10  ;;  %v521_v10 = vld [vmem:[%s2077_s28 + $0xb00] sm:$0xff]  ;;  %v1034_v13 = vmul.f32 %v2087_v4, %v520_v8 }
 0x175   : > { %1514 = vst [vmem:[%s2096_s21 + $0x9f8] sm:$0xff] %v1002_v12  ;;  %v522_v12 = vld [vmem:[%s2077_s28 + $0xb08] sm:$0xff]  ;;  %v1035_v15 = vmul.f32 %v2087_v4, %v521_v10 }
 0x176   : > { %1515 = vst [vmem:[%s2096_s21 + $0xa00] sm:$0xff] %v1003_v14  ;;  %v523_v14 = vld [vmem:[%s2077_s28 + $0xb10] sm:$0xff]  ;;  %v1036_v17 = vmul.f32 %v2087_v4, %v522_v12 }
 0x177   : > { %1516 = vst [vmem:[%s2096_s21 + $0xa08] sm:$0xff] %v1004_v16  ;;  %v524_v16 = vld [vmem:[%s2077_s28 + $0xb18] sm:$0xff]  ;;  %v1037_v19 = vmul.f32 %v2087_v4, %v523_v14 }
 0x178   : > { %1517 = vst [vmem:[%s2096_s21 + $0xa10] sm:$0xff] %v1005_v18  ;;  %v525_v18 = vld [vmem:[%s2077_s28 + $0xb20] sm:$0xff]  ;;  %v1038_v21 = vmul.f32 %v2087_v4, %v524_v16 }
 0x179   : > { %1518 = vst [vmem:[%s2096_s21 + $0xa18] sm:$0xff] %v1006_v20  ;;  %v526_v20 = vld [vmem:[%s2077_s28 + $0xb28] sm:$0xff]  ;;  %v1039_v23 = vmul.f32 %v2087_v4, %v525_v18 }
 0x17a   : > { %1519 = vst [vmem:[%s2096_s21 + $0xa20] sm:$0xff] %v1007_v22  ;;  %v527_v22 = vld [vmem:[%s2077_s28 + $0xb30] sm:$0xff]  ;;  %v1040_v25 = vmul.f32 %v2087_v4, %v526_v20 }
 0x17b   : > { %1520 = vst [vmem:[%s2096_s21 + $0xa28] sm:$0xff] %v1008_v24  ;;  %v528_v24 = vld [vmem:[%s2077_s28 + $0xb38] sm:$0xff]  ;;  %v1041_v27 = vmul.f32 %v2087_v4, %v527_v22 }
 0x17c   : > { %1521 = vst [vmem:[%s2096_s21 + $0xa30] sm:$0xff] %v1009_v26  ;;  %v529_v26 = vld [vmem:[%s2077_s28 + $0xb40] sm:$0xff]  ;;  %v1042_v29 = vmul.f32 %v2087_v4, %v528_v24 }
 0x17d   : > { %1522 = vst [vmem:[%s2096_s21 + $0xa38] sm:$0xff] %v1010_v28  ;;  %v530_v28 = vld [vmem:[%s2077_s28 + $0xb48] sm:$0xff]  ;;  %v1043_v31 = vmul.f32 %v2087_v4, %v529_v26 }
 0x17e   : > { %1523 = vst [vmem:[%s2096_s21 + $0xa40] sm:$0xff] %v1011_v30  ;;  %v531_v30 = vld [vmem:[%s2077_s28 + $0xb50] sm:$0xff]  ;;  %v1044_v33 = vmul.f32 %v2087_v4, %v530_v28 }
 0x17f   : > { %1524 = vst [vmem:[%s2096_s21 + $0xa48] sm:$0xff] %v1012_v32  ;;  %v532_v32 = vld [vmem:[%s2077_s28 + $0xb58] sm:$0xff]  ;;  %v1045_v35 = vmul.f32 %v2087_v4, %v531_v30 }
 0x180   : > { %1525 = vst [vmem:[%s2096_s21 + $0xa50] sm:$0xff] %v1013_v34  ;;  %v533_v34 = vld [vmem:[%s2077_s28 + $0xb60] sm:$0xff]  ;;  %v1046_v37 = vmul.f32 %v2087_v4, %v532_v32 }
 0x181   : > { %1526 = vst [vmem:[%s2096_s21 + $0xa58] sm:$0xff] %v1014_v36  ;;  %v534_v36 = vld [vmem:[%s2077_s28 + $0xb68] sm:$0xff]  ;;  %v1047_v39 = vmul.f32 %v2087_v4, %v533_v34 }
 0x182   : > { %1527 = vst [vmem:[%s2096_s21 + $0xa60] sm:$0xff] %v1015_v38  ;;  %v535_v38 = vld [vmem:[%s2077_s28 + $0xb70] sm:$0xff]  ;;  %v1048_v41 = vmul.f32 %v2087_v4, %v534_v36 }
 0x183   : > { %1528 = vst [vmem:[%s2096_s21 + $0xa68] sm:$0xff] %v1016_v40  ;;  %v536_v40 = vld [vmem:[%s2077_s28 + $0xb78] sm:$0xff]  ;;  %v1049_v43 = vmul.f32 %v2087_v4, %v535_v38 }
 0x184   : > { %1529 = vst [vmem:[%s2096_s21 + $0xa70] sm:$0xff] %v1017_v42  ;;  %v537_v42 = vld [vmem:[%s2077_s28 + $0xb80] sm:$0xff]  ;;  %v1050_v45 = vmul.f32 %v2087_v4, %v536_v40 }
 0x185   : > { %1530 = vst [vmem:[%s2096_s21 + $0xa78] sm:$0xff] %v1018_v44  ;;  %v538_v44 = vld [vmem:[%s2077_s28 + $0xb88] sm:$0xff]  ;;  %v1051_v47 = vmul.f32 %v2087_v4, %v537_v42 }
 0x186   : > { %1531 = vst [vmem:[%s2096_s21 + $0xa80] sm:$0xff] %v1019_v46  ;;  %v539_v46 = vld [vmem:[%s2077_s28 + $0xb90] sm:$0xff]  ;;  %v1052_v49 = vmul.f32 %v2087_v4, %v538_v44 }
 0x187   : > { %1532 = vst [vmem:[%s2096_s21 + $0xa88] sm:$0xff] %v1020_v48  ;;  %v540_v48 = vld [vmem:[%s2077_s28 + $0xb98] sm:$0xff]  ;;  %v1053_v51 = vmul.f32 %v2087_v4, %v539_v46 }
 0x188   : > { %1533 = vst [vmem:[%s2096_s21 + $0xa90] sm:$0xff] %v1021_v50  ;;  %v541_v50 = vld [vmem:[%s2077_s28 + $0xba0] sm:$0xff]  ;;  %v1054_v53 = vmul.f32 %v2087_v4, %v540_v48 }
 0x189   : > { %1534 = vst [vmem:[%s2096_s21 + $0xa98] sm:$0xff] %v1022_v52  ;;  %v542_v52 = vld [vmem:[%s2077_s28 + $0xba8] sm:$0xff]  ;;  %v1055_v55 = vmul.f32 %v2087_v4, %v541_v50 }
 0x18a   : > { %1535 = vst [vmem:[%s2096_s21 + $0xaa0] sm:$0xff] %v1023_v54  ;;  %v543_v54 = vld [vmem:[%s2077_s28 + $0xbb0] sm:$0xff]  ;;  %v1056_v57 = vmul.f32 %v2087_v4, %v542_v52 }
 0x18b   : > { %1536 = vst [vmem:[%s2096_s21 + $0xaa8] sm:$0xff] %v1024_v56  ;;  %v544_v56 = vld [vmem:[%s2077_s28 + $0xbb8] sm:$0xff]  ;;  %v1057_v59 = vmul.f32 %v2087_v4, %v543_v54 }
 0x18c   : > { %1537 = vst [vmem:[%s2096_s21 + $0xab0] sm:$0xff] %v1025_v58  ;;  %v545_v58 = vld [vmem:[%s2077_s28 + $0xbc0] sm:$0xff]  ;;  %v1058_v61 = vmul.f32 %v2087_v4, %v544_v56 }
 0x18d   : > { %1538 = vst [vmem:[%s2096_s21 + $0xab8] sm:$0xff] %v1026_v60  ;;  %v546_v60 = vld [vmem:[%s2077_s28 + $0xbc8] sm:$0xff]  ;;  %v1059_v63 = vmul.f32 %v2087_v4, %v545_v58 }
 0x18e   : > { %1539 = vst [vmem:[%s2096_s21 + $0xac0] sm:$0xff] %v1027_v62  ;;  %v547_v62 = vld [vmem:[%s2077_s28 + $0xbd0] sm:$0xff]  ;;  %v1060_v1 = vmul.f32 %v2087_v4, %v546_v60 }
 0x18f   : > { %1540 = vst [vmem:[%s2096_s21 + $0xac8] sm:$0xff] %v1028_v0  ;;  %v548_v0 = vld [vmem:[%s2077_s28 + $0xbd8] sm:$0xff]  ;;  %v1061_v3 = vmul.f32 %v2087_v4, %v547_v62 }
 0x190   : > { %1541 = vst [vmem:[%s2096_s21 + $0xad0] sm:$0xff] %v1029_v2  ;;  %v549_v2 = vld [vmem:[%s2077_s28 + $0xbe0] sm:$0xff]  ;;  %v1062_v6 = vmul.f32 %v2087_v4, %v548_v0 }
 0x191   : > { %1542 = vst [vmem:[%s2096_s21 + $0xad8] sm:$0xff] %v1030_v5  ;;  %v550_v5 = vld [vmem:[%s2077_s28 + $0xbe8] sm:$0xff]  ;;  %v1063_v8 = vmul.f32 %v2087_v4, %v549_v2 }
 0x192   : > { %1543 = vst [vmem:[%s2096_s21 + $0xae0] sm:$0xff] %v1031_v7  ;;  %v551_v7 = vld [vmem:[%s2077_s28 + $0xbf0] sm:$0xff]  ;;  %v1064_v10 = vmul.f32 %v2087_v4, %v550_v5 }
 0x193   : > { %1544 = vst [vmem:[%s2096_s21 + $0xae8] sm:$0xff] %v1032_v9  ;;  %v552_v9 = vld [vmem:[%s2077_s28 + $0xbf8] sm:$0xff]  ;;  %v1065_v12 = vmul.f32 %v2087_v4, %v551_v7 }
 0x194   : > { %1545 = vst [vmem:[%s2096_s21 + $0xaf0] sm:$0xff] %v1033_v11  ;;  %v553_v11 = vld [vmem:[%s2077_s28 + $0xc00] sm:$0xff]  ;;  %v1066_v14 = vmul.f32 %v2087_v4, %v552_v9 }
 0x195   : > { %1546 = vst [vmem:[%s2096_s21 + $0xaf8] sm:$0xff] %v1034_v13  ;;  %v554_v13 = vld [vmem:[%s2077_s28 + $0xc08] sm:$0xff]  ;;  %v1067_v16 = vmul.f32 %v2087_v4, %v553_v11 }
 0x196   : > { %1547 = vst [vmem:[%s2096_s21 + $0xb00] sm:$0xff] %v1035_v15  ;;  %v555_v15 = vld [vmem:[%s2077_s28 + $0xc10] sm:$0xff]  ;;  %v1068_v18 = vmul.f32 %v2087_v4, %v554_v13 }
 0x197   : > { %1548 = vst [vmem:[%s2096_s21 + $0xb08] sm:$0xff] %v1036_v17  ;;  %v556_v17 = vld [vmem:[%s2077_s28 + $0xc18] sm:$0xff]  ;;  %v1069_v20 = vmul.f32 %v2087_v4, %v555_v15 }
 0x198   : > { %1549 = vst [vmem:[%s2096_s21 + $0xb10] sm:$0xff] %v1037_v19  ;;  %v557_v19 = vld [vmem:[%s2077_s28 + $0xc20] sm:$0xff]  ;;  %v1070_v22 = vmul.f32 %v2087_v4, %v556_v17 }
 0x199   : > { %1550 = vst [vmem:[%s2096_s21 + $0xb18] sm:$0xff] %v1038_v21  ;;  %v558_v21 = vld [vmem:[%s2077_s28 + $0xc28] sm:$0xff]  ;;  %v1071_v24 = vmul.f32 %v2087_v4, %v557_v19 }
 0x19a   : > { %1551 = vst [vmem:[%s2096_s21 + $0xb20] sm:$0xff] %v1039_v23  ;;  %v559_v23 = vld [vmem:[%s2077_s28 + $0xc30] sm:$0xff]  ;;  %v1072_v26 = vmul.f32 %v2087_v4, %v558_v21 }
 0x19b   : > { %1552 = vst [vmem:[%s2096_s21 + $0xb28] sm:$0xff] %v1040_v25  ;;  %v560_v25 = vld [vmem:[%s2077_s28 + $0xc38] sm:$0xff]  ;;  %v1073_v28 = vmul.f32 %v2087_v4, %v559_v23 }
 0x19c   : > { %1553 = vst [vmem:[%s2096_s21 + $0xb30] sm:$0xff] %v1041_v27  ;;  %v561_v27 = vld [vmem:[%s2077_s28 + $0xc40] sm:$0xff]  ;;  %v1074_v30 = vmul.f32 %v2087_v4, %v560_v25 }
 0x19d   : > { %1554 = vst [vmem:[%s2096_s21 + $0xb38] sm:$0xff] %v1042_v29  ;;  %v562_v29 = vld [vmem:[%s2077_s28 + $0xc48] sm:$0xff]  ;;  %v1075_v32 = vmul.f32 %v2087_v4, %v561_v27 }
 0x19e   : > { %1555 = vst [vmem:[%s2096_s21 + $0xb40] sm:$0xff] %v1043_v31  ;;  %v563_v31 = vld [vmem:[%s2077_s28 + $0xc50] sm:$0xff]  ;;  %v1076_v34 = vmul.f32 %v2087_v4, %v562_v29 }
 0x19f   : > { %1556 = vst [vmem:[%s2096_s21 + $0xb48] sm:$0xff] %v1044_v33  ;;  %v564_v33 = vld [vmem:[%s2077_s28 + $0xc58] sm:$0xff]  ;;  %v1077_v36 = vmul.f32 %v2087_v4, %v563_v31 }
 0x1a0   : > { %1557 = vst [vmem:[%s2096_s21 + $0xb50] sm:$0xff] %v1045_v35  ;;  %v565_v35 = vld [vmem:[%s2077_s28 + $0xc60] sm:$0xff]  ;;  %v1078_v38 = vmul.f32 %v2087_v4, %v564_v33 }
 0x1a1   : > { %1558 = vst [vmem:[%s2096_s21 + $0xb58] sm:$0xff] %v1046_v37  ;;  %v566_v37 = vld [vmem:[%s2077_s28 + $0xc68] sm:$0xff]  ;;  %v1079_v40 = vmul.f32 %v2087_v4, %v565_v35 }
 0x1a2   : > { %1559 = vst [vmem:[%s2096_s21 + $0xb60] sm:$0xff] %v1047_v39  ;;  %v567_v39 = vld [vmem:[%s2077_s28 + $0xc70] sm:$0xff]  ;;  %v1080_v42 = vmul.f32 %v2087_v4, %v566_v37 }
 0x1a3   : > { %1560 = vst [vmem:[%s2096_s21 + $0xb68] sm:$0xff] %v1048_v41  ;;  %v568_v41 = vld [vmem:[%s2077_s28 + $0xc78] sm:$0xff]  ;;  %v1081_v44 = vmul.f32 %v2087_v4, %v567_v39 }
 0x1a4   : > { %1561 = vst [vmem:[%s2096_s21 + $0xb70] sm:$0xff] %v1049_v43  ;;  %v569_v43 = vld [vmem:[%s2077_s28 + $0xc80] sm:$0xff]  ;;  %v1082_v46 = vmul.f32 %v2087_v4, %v568_v41 }
 0x1a5   : > { %1562 = vst [vmem:[%s2096_s21 + $0xb78] sm:$0xff] %v1050_v45  ;;  %v570_v45 = vld [vmem:[%s2077_s28 + $0xc88] sm:$0xff]  ;;  %v1083_v48 = vmul.f32 %v2087_v4, %v569_v43 }
 0x1a6   : > { %1563 = vst [vmem:[%s2096_s21 + $0xb80] sm:$0xff] %v1051_v47  ;;  %v571_v47 = vld [vmem:[%s2077_s28 + $0xc90] sm:$0xff]  ;;  %v1084_v50 = vmul.f32 %v2087_v4, %v570_v45 }
 0x1a7   : > { %1564 = vst [vmem:[%s2096_s21 + $0xb88] sm:$0xff] %v1052_v49  ;;  %v572_v49 = vld [vmem:[%s2077_s28 + $0xc98] sm:$0xff]  ;;  %v1085_v52 = vmul.f32 %v2087_v4, %v571_v47 }
 0x1a8   : > { %1565 = vst [vmem:[%s2096_s21 + $0xb90] sm:$0xff] %v1053_v51  ;;  %v573_v51 = vld [vmem:[%s2077_s28 + $0xca0] sm:$0xff]  ;;  %v1086_v54 = vmul.f32 %v2087_v4, %v572_v49 }
 0x1a9   : > { %1566 = vst [vmem:[%s2096_s21 + $0xb98] sm:$0xff] %v1054_v53  ;;  %v574_v53 = vld [vmem:[%s2077_s28 + $0xca8] sm:$0xff]  ;;  %v1087_v56 = vmul.f32 %v2087_v4, %v573_v51 }
 0x1aa   : > { %1567 = vst [vmem:[%s2096_s21 + $0xba0] sm:$0xff] %v1055_v55  ;;  %v575_v55 = vld [vmem:[%s2077_s28 + $0xcb0] sm:$0xff]  ;;  %v1088_v58 = vmul.f32 %v2087_v4, %v574_v53 }
 0x1ab   : > { %1568 = vst [vmem:[%s2096_s21 + $0xba8] sm:$0xff] %v1056_v57  ;;  %v576_v57 = vld [vmem:[%s2077_s28 + $0xcb8] sm:$0xff]  ;;  %v1089_v60 = vmul.f32 %v2087_v4, %v575_v55 }
 0x1ac   : > { %1569 = vst [vmem:[%s2096_s21 + $0xbb0] sm:$0xff] %v1057_v59  ;;  %v577_v59 = vld [vmem:[%s2077_s28 + $0xcc0] sm:$0xff]  ;;  %v1090_v62 = vmul.f32 %v2087_v4, %v576_v57 }
 0x1ad   : > { %1570 = vst [vmem:[%s2096_s21 + $0xbb8] sm:$0xff] %v1058_v61  ;;  %v578_v61 = vld [vmem:[%s2077_s28 + $0xcc8] sm:$0xff]  ;;  %v1091_v0 = vmul.f32 %v2087_v4, %v577_v59 }
 0x1ae   : > { %1571 = vst [vmem:[%s2096_s21 + $0xbc0] sm:$0xff] %v1059_v63  ;;  %v579_v63 = vld [vmem:[%s2077_s28 + $0xcd0] sm:$0xff]  ;;  %v1092_v2 = vmul.f32 %v2087_v4, %v578_v61 }
 0x1af   : > { %1572 = vst [vmem:[%s2096_s21 + $0xbc8] sm:$0xff] %v1060_v1  ;;  %v580_v1 = vld [vmem:[%s2077_s28 + $0xcd8] sm:$0xff]  ;;  %v1093_v5 = vmul.f32 %v2087_v4, %v579_v63 }
 0x1b0   : > { %1573 = vst [vmem:[%s2096_s21 + $0xbd0] sm:$0xff] %v1061_v3  ;;  %v581_v3 = vld [vmem:[%s2077_s28 + $0xce0] sm:$0xff]  ;;  %v1094_v7 = vmul.f32 %v2087_v4, %v580_v1 }
 0x1b1   : > { %1574 = vst [vmem:[%s2096_s21 + $0xbd8] sm:$0xff] %v1062_v6  ;;  %v582_v6 = vld [vmem:[%s2077_s28 + $0xce8] sm:$0xff]  ;;  %v1095_v9 = vmul.f32 %v2087_v4, %v581_v3 }
 0x1b2   : > { %1575 = vst [vmem:[%s2096_s21 + $0xbe0] sm:$0xff] %v1063_v8  ;;  %v583_v8 = vld [vmem:[%s2077_s28 + $0xcf0] sm:$0xff]  ;;  %v1096_v11 = vmul.f32 %v2087_v4, %v582_v6 }
 0x1b3   : > { %1576 = vst [vmem:[%s2096_s21 + $0xbe8] sm:$0xff] %v1064_v10  ;;  %v584_v10 = vld [vmem:[%s2077_s28 + $0xcf8] sm:$0xff]  ;;  %v1097_v13 = vmul.f32 %v2087_v4, %v583_v8 }
 0x1b4   : > { %1577 = vst [vmem:[%s2096_s21 + $0xbf0] sm:$0xff] %v1065_v12  ;;  %v585_v12 = vld [vmem:[%s2077_s28 + $0xd00] sm:$0xff]  ;;  %v1098_v15 = vmul.f32 %v2087_v4, %v584_v10 }
 0x1b5   : > { %1578 = vst [vmem:[%s2096_s21 + $0xbf8] sm:$0xff] %v1066_v14  ;;  %v586_v14 = vld [vmem:[%s2077_s28 + $0xd08] sm:$0xff]  ;;  %v1099_v17 = vmul.f32 %v2087_v4, %v585_v12 }
 0x1b6   : > { %1579 = vst [vmem:[%s2096_s21 + $0xc00] sm:$0xff] %v1067_v16  ;;  %v587_v16 = vld [vmem:[%s2077_s28 + $0xd10] sm:$0xff]  ;;  %v1100_v19 = vmul.f32 %v2087_v4, %v586_v14 }
 0x1b7   : > { %1580 = vst [vmem:[%s2096_s21 + $0xc08] sm:$0xff] %v1068_v18  ;;  %v588_v18 = vld [vmem:[%s2077_s28 + $0xd18] sm:$0xff]  ;;  %v1101_v21 = vmul.f32 %v2087_v4, %v587_v16 }
 0x1b8   : > { %1581 = vst [vmem:[%s2096_s21 + $0xc10] sm:$0xff] %v1069_v20  ;;  %v589_v20 = vld [vmem:[%s2077_s28 + $0xd20] sm:$0xff]  ;;  %v1102_v23 = vmul.f32 %v2087_v4, %v588_v18 }
 0x1b9   : > { %1582 = vst [vmem:[%s2096_s21 + $0xc18] sm:$0xff] %v1070_v22  ;;  %v590_v22 = vld [vmem:[%s2077_s28 + $0xd28] sm:$0xff]  ;;  %v1103_v25 = vmul.f32 %v2087_v4, %v589_v20 }
 0x1ba   : > { %1583 = vst [vmem:[%s2096_s21 + $0xc20] sm:$0xff] %v1071_v24  ;;  %v591_v24 = vld [vmem:[%s2077_s28 + $0xd30] sm:$0xff]  ;;  %v1104_v27 = vmul.f32 %v2087_v4, %v590_v22 }
 0x1bb   : > { %1584 = vst [vmem:[%s2096_s21 + $0xc28] sm:$0xff] %v1072_v26  ;;  %v592_v26 = vld [vmem:[%s2077_s28 + $0xd38] sm:$0xff]  ;;  %v1105_v29 = vmul.f32 %v2087_v4, %v591_v24 }
 0x1bc   : > { %1585 = vst [vmem:[%s2096_s21 + $0xc30] sm:$0xff] %v1073_v28  ;;  %v593_v28 = vld [vmem:[%s2077_s28 + $0xd40] sm:$0xff]  ;;  %v1106_v31 = vmul.f32 %v2087_v4, %v592_v26 }
 0x1bd   : > { %1586 = vst [vmem:[%s2096_s21 + $0xc38] sm:$0xff] %v1074_v30  ;;  %v594_v30 = vld [vmem:[%s2077_s28 + $0xd48] sm:$0xff]  ;;  %v1107_v33 = vmul.f32 %v2087_v4, %v593_v28 }
 0x1be   : > { %1587 = vst [vmem:[%s2096_s21 + $0xc40] sm:$0xff] %v1075_v32  ;;  %v595_v32 = vld [vmem:[%s2077_s28 + $0xd50] sm:$0xff]  ;;  %v1108_v35 = vmul.f32 %v2087_v4, %v594_v30 }
 0x1bf   : > { %1588 = vst [vmem:[%s2096_s21 + $0xc48] sm:$0xff] %v1076_v34  ;;  %v596_v34 = vld [vmem:[%s2077_s28 + $0xd58] sm:$0xff]  ;;  %v1109_v37 = vmul.f32 %v2087_v4, %v595_v32 }
 0x1c0   : > { %1589 = vst [vmem:[%s2096_s21 + $0xc50] sm:$0xff] %v1077_v36  ;;  %v597_v36 = vld [vmem:[%s2077_s28 + $0xd60] sm:$0xff]  ;;  %v1110_v39 = vmul.f32 %v2087_v4, %v596_v34 }
 0x1c1   : > { %1590 = vst [vmem:[%s2096_s21 + $0xc58] sm:$0xff] %v1078_v38  ;;  %v598_v38 = vld [vmem:[%s2077_s28 + $0xd68] sm:$0xff]  ;;  %v1111_v41 = vmul.f32 %v2087_v4, %v597_v36 }
 0x1c2   : > { %1591 = vst [vmem:[%s2096_s21 + $0xc60] sm:$0xff] %v1079_v40  ;;  %v599_v40 = vld [vmem:[%s2077_s28 + $0xd70] sm:$0xff]  ;;  %v1112_v43 = vmul.f32 %v2087_v4, %v598_v38 }
 0x1c3   : > { %1592 = vst [vmem:[%s2096_s21 + $0xc68] sm:$0xff] %v1080_v42  ;;  %v600_v42 = vld [vmem:[%s2077_s28 + $0xd78] sm:$0xff]  ;;  %v1113_v45 = vmul.f32 %v2087_v4, %v599_v40 }
 0x1c4   : > { %1593 = vst [vmem:[%s2096_s21 + $0xc70] sm:$0xff] %v1081_v44  ;;  %v601_v44 = vld [vmem:[%s2077_s28 + $0xd80] sm:$0xff]  ;;  %v1114_v47 = vmul.f32 %v2087_v4, %v600_v42 }
 0x1c5   : > { %1594 = vst [vmem:[%s2096_s21 + $0xc78] sm:$0xff] %v1082_v46  ;;  %v602_v46 = vld [vmem:[%s2077_s28 + $0xd88] sm:$0xff]  ;;  %v1115_v49 = vmul.f32 %v2087_v4, %v601_v44 }
 0x1c6   : > { %1595 = vst [vmem:[%s2096_s21 + $0xc80] sm:$0xff] %v1083_v48  ;;  %v603_v48 = vld [vmem:[%s2077_s28 + $0xd90] sm:$0xff]  ;;  %v1116_v51 = vmul.f32 %v2087_v4, %v602_v46 }
 0x1c7   : > { %1596 = vst [vmem:[%s2096_s21 + $0xc88] sm:$0xff] %v1084_v50  ;;  %v604_v50 = vld [vmem:[%s2077_s28 + $0xd98] sm:$0xff]  ;;  %v1117_v53 = vmul.f32 %v2087_v4, %v603_v48 }
 0x1c8   : > { %1597 = vst [vmem:[%s2096_s21 + $0xc90] sm:$0xff] %v1085_v52  ;;  %v605_v52 = vld [vmem:[%s2077_s28 + $0xda0] sm:$0xff]  ;;  %v1118_v55 = vmul.f32 %v2087_v4, %v604_v50 }
 0x1c9   : > { %1598 = vst [vmem:[%s2096_s21 + $0xc98] sm:$0xff] %v1086_v54  ;;  %v606_v54 = vld [vmem:[%s2077_s28 + $0xda8] sm:$0xff]  ;;  %v1119_v57 = vmul.f32 %v2087_v4, %v605_v52 }
 0x1ca   : > { %1599 = vst [vmem:[%s2096_s21 + $0xca0] sm:$0xff] %v1087_v56  ;;  %v607_v56 = vld [vmem:[%s2077_s28 + $0xdb0] sm:$0xff]  ;;  %v1120_v59 = vmul.f32 %v2087_v4, %v606_v54 }
 0x1cb   : > { %1600 = vst [vmem:[%s2096_s21 + $0xca8] sm:$0xff] %v1088_v58  ;;  %v608_v58 = vld [vmem:[%s2077_s28 + $0xdb8] sm:$0xff]  ;;  %v1121_v61 = vmul.f32 %v2087_v4, %v607_v56 }
 0x1cc   : > { %1601 = vst [vmem:[%s2096_s21 + $0xcb0] sm:$0xff] %v1089_v60  ;;  %v609_v60 = vld [vmem:[%s2077_s28 + $0xdc0] sm:$0xff]  ;;  %v1122_v63 = vmul.f32 %v2087_v4, %v608_v58 }
 0x1cd   : > { %1602 = vst [vmem:[%s2096_s21 + $0xcb8] sm:$0xff] %v1090_v62  ;;  %v610_v62 = vld [vmem:[%s2077_s28 + $0xdc8] sm:$0xff]  ;;  %v1123_v1 = vmul.f32 %v2087_v4, %v609_v60 }
 0x1ce   : > { %1603 = vst [vmem:[%s2096_s21 + $0xcc0] sm:$0xff] %v1091_v0  ;;  %v611_v0 = vld [vmem:[%s2077_s28 + $0xdd0] sm:$0xff]  ;;  %v1124_v3 = vmul.f32 %v2087_v4, %v610_v62 }
 0x1cf   : > { %1604 = vst [vmem:[%s2096_s21 + $0xcc8] sm:$0xff] %v1092_v2  ;;  %v612_v2 = vld [vmem:[%s2077_s28 + $0xdd8] sm:$0xff]  ;;  %v1125_v6 = vmul.f32 %v2087_v4, %v611_v0 }
 0x1d0   : > { %1605 = vst [vmem:[%s2096_s21 + $0xcd0] sm:$0xff] %v1093_v5  ;;  %v613_v5 = vld [vmem:[%s2077_s28 + $0xde0] sm:$0xff]  ;;  %v1126_v8 = vmul.f32 %v2087_v4, %v612_v2 }
 0x1d1   : > { %1606 = vst [vmem:[%s2096_s21 + $0xcd8] sm:$0xff] %v1094_v7  ;;  %v614_v7 = vld [vmem:[%s2077_s28 + $0xde8] sm:$0xff]  ;;  %v1127_v10 = vmul.f32 %v2087_v4, %v613_v5 }
 0x1d2   : > { %1607 = vst [vmem:[%s2096_s21 + $0xce0] sm:$0xff] %v1095_v9  ;;  %v615_v9 = vld [vmem:[%s2077_s28 + $0xdf0] sm:$0xff]  ;;  %v1128_v12 = vmul.f32 %v2087_v4, %v614_v7 }
 0x1d3   : > { %1608 = vst [vmem:[%s2096_s21 + $0xce8] sm:$0xff] %v1096_v11  ;;  %v616_v11 = vld [vmem:[%s2077_s28 + $0xdf8] sm:$0xff]  ;;  %v1129_v14 = vmul.f32 %v2087_v4, %v615_v9 }
 0x1d4   : > { %1609 = vst [vmem:[%s2096_s21 + $0xcf0] sm:$0xff] %v1097_v13  ;;  %v617_v13 = vld [vmem:[%s2077_s28 + $0xe00] sm:$0xff]  ;;  %v1130_v16 = vmul.f32 %v2087_v4, %v616_v11 }
 0x1d5   : > { %1610 = vst [vmem:[%s2096_s21 + $0xcf8] sm:$0xff] %v1098_v15  ;;  %v618_v15 = vld [vmem:[%s2077_s28 + $0xe08] sm:$0xff]  ;;  %v1131_v18 = vmul.f32 %v2087_v4, %v617_v13 }
 0x1d6   : > { %1611 = vst [vmem:[%s2096_s21 + $0xd00] sm:$0xff] %v1099_v17  ;;  %v619_v17 = vld [vmem:[%s2077_s28 + $0xe10] sm:$0xff]  ;;  %v1132_v20 = vmul.f32 %v2087_v4, %v618_v15 }
 0x1d7   : > { %1612 = vst [vmem:[%s2096_s21 + $0xd08] sm:$0xff] %v1100_v19  ;;  %v620_v19 = vld [vmem:[%s2077_s28 + $0xe18] sm:$0xff]  ;;  %v1133_v22 = vmul.f32 %v2087_v4, %v619_v17 }
 0x1d8   : > { %1613 = vst [vmem:[%s2096_s21 + $0xd10] sm:$0xff] %v1101_v21  ;;  %v621_v21 = vld [vmem:[%s2077_s28 + $0xe20] sm:$0xff]  ;;  %v1134_v24 = vmul.f32 %v2087_v4, %v620_v19 }
 0x1d9   : > { %1614 = vst [vmem:[%s2096_s21 + $0xd18] sm:$0xff] %v1102_v23  ;;  %v622_v23 = vld [vmem:[%s2077_s28 + $0xe28] sm:$0xff]  ;;  %v1135_v26 = vmul.f32 %v2087_v4, %v621_v21 }
 0x1da   : > { %1615 = vst [vmem:[%s2096_s21 + $0xd20] sm:$0xff] %v1103_v25  ;;  %v623_v25 = vld [vmem:[%s2077_s28 + $0xe30] sm:$0xff]  ;;  %v1136_v28 = vmul.f32 %v2087_v4, %v622_v23 }
 0x1db   : > { %1616 = vst [vmem:[%s2096_s21 + $0xd28] sm:$0xff] %v1104_v27  ;;  %v624_v27 = vld [vmem:[%s2077_s28 + $0xe38] sm:$0xff]  ;;  %v1137_v30 = vmul.f32 %v2087_v4, %v623_v25 }
 0x1dc   : > { %1617 = vst [vmem:[%s2096_s21 + $0xd30] sm:$0xff] %v1105_v29  ;;  %v625_v29 = vld [vmem:[%s2077_s28 + $0xe40] sm:$0xff]  ;;  %v1138_v32 = vmul.f32 %v2087_v4, %v624_v27 }
 0x1dd   : > { %1618 = vst [vmem:[%s2096_s21 + $0xd38] sm:$0xff] %v1106_v31  ;;  %v626_v31 = vld [vmem:[%s2077_s28 + $0xe48] sm:$0xff]  ;;  %v1139_v34 = vmul.f32 %v2087_v4, %v625_v29 }
 0x1de   : > { %1619 = vst [vmem:[%s2096_s21 + $0xd40] sm:$0xff] %v1107_v33  ;;  %v627_v33 = vld [vmem:[%s2077_s28 + $0xe50] sm:$0xff]  ;;  %v1140_v36 = vmul.f32 %v2087_v4, %v626_v31 }
 0x1df   : > { %1620 = vst [vmem:[%s2096_s21 + $0xd48] sm:$0xff] %v1108_v35  ;;  %v628_v35 = vld [vmem:[%s2077_s28 + $0xe58] sm:$0xff]  ;;  %v1141_v38 = vmul.f32 %v2087_v4, %v627_v33 }
 0x1e0   : > { %1621 = vst [vmem:[%s2096_s21 + $0xd50] sm:$0xff] %v1109_v37  ;;  %v629_v37 = vld [vmem:[%s2077_s28 + $0xe60] sm:$0xff]  ;;  %v1142_v40 = vmul.f32 %v2087_v4, %v628_v35 }
 0x1e1   : > { %1622 = vst [vmem:[%s2096_s21 + $0xd58] sm:$0xff] %v1110_v39  ;;  %v630_v39 = vld [vmem:[%s2077_s28 + $0xe68] sm:$0xff]  ;;  %v1143_v42 = vmul.f32 %v2087_v4, %v629_v37 }
 0x1e2   : > { %1623 = vst [vmem:[%s2096_s21 + $0xd60] sm:$0xff] %v1111_v41  ;;  %v631_v41 = vld [vmem:[%s2077_s28 + $0xe70] sm:$0xff]  ;;  %v1144_v44 = vmul.f32 %v2087_v4, %v630_v39 }
 0x1e3   : > { %1624 = vst [vmem:[%s2096_s21 + $0xd68] sm:$0xff] %v1112_v43  ;;  %v632_v43 = vld [vmem:[%s2077_s28 + $0xe78] sm:$0xff]  ;;  %v1145_v46 = vmul.f32 %v2087_v4, %v631_v41 }
 0x1e4   : > { %1625 = vst [vmem:[%s2096_s21 + $0xd70] sm:$0xff] %v1113_v45  ;;  %v633_v45 = vld [vmem:[%s2077_s28 + $0xe80] sm:$0xff]  ;;  %v1146_v48 = vmul.f32 %v2087_v4, %v632_v43 }
 0x1e5   : > { %1626 = vst [vmem:[%s2096_s21 + $0xd78] sm:$0xff] %v1114_v47  ;;  %v634_v47 = vld [vmem:[%s2077_s28 + $0xe88] sm:$0xff]  ;;  %v1147_v50 = vmul.f32 %v2087_v4, %v633_v45 }
 0x1e6   : > { %1627 = vst [vmem:[%s2096_s21 + $0xd80] sm:$0xff] %v1115_v49  ;;  %v635_v49 = vld [vmem:[%s2077_s28 + $0xe90] sm:$0xff]  ;;  %v1148_v52 = vmul.f32 %v2087_v4, %v634_v47 }
 0x1e7   : > { %1628 = vst [vmem:[%s2096_s21 + $0xd88] sm:$0xff] %v1116_v51  ;;  %v636_v51 = vld [vmem:[%s2077_s28 + $0xe98] sm:$0xff]  ;;  %v1149_v54 = vmul.f32 %v2087_v4, %v635_v49 }
 0x1e8   : > { %1629 = vst [vmem:[%s2096_s21 + $0xd90] sm:$0xff] %v1117_v53  ;;  %v637_v53 = vld [vmem:[%s2077_s28 + $0xea0] sm:$0xff]  ;;  %v1150_v56 = vmul.f32 %v2087_v4, %v636_v51 }
 0x1e9   : > { %1630 = vst [vmem:[%s2096_s21 + $0xd98] sm:$0xff] %v1118_v55  ;;  %v638_v55 = vld [vmem:[%s2077_s28 + $0xea8] sm:$0xff]  ;;  %v1151_v58 = vmul.f32 %v2087_v4, %v637_v53 }
 0x1ea   : > { %1631 = vst [vmem:[%s2096_s21 + $0xda0] sm:$0xff] %v1119_v57  ;;  %v639_v57 = vld [vmem:[%s2077_s28 + $0xeb0] sm:$0xff]  ;;  %v1152_v60 = vmul.f32 %v2087_v4, %v638_v55 }
 0x1eb   : > { %1632 = vst [vmem:[%s2096_s21 + $0xda8] sm:$0xff] %v1120_v59  ;;  %v640_v59 = vld [vmem:[%s2077_s28 + $0xeb8] sm:$0xff]  ;;  %v1153_v62 = vmul.f32 %v2087_v4, %v639_v57 }
 0x1ec   : > { %1633 = vst [vmem:[%s2096_s21 + $0xdb0] sm:$0xff] %v1121_v61  ;;  %v641_v61 = vld [vmem:[%s2077_s28 + $0xec0] sm:$0xff]  ;;  %v1154_v0 = vmul.f32 %v2087_v4, %v640_v59 }
 0x1ed   : > { %1634 = vst [vmem:[%s2096_s21 + $0xdb8] sm:$0xff] %v1122_v63  ;;  %v642_v63 = vld [vmem:[%s2077_s28 + $0xec8] sm:$0xff]  ;;  %v1155_v2 = vmul.f32 %v2087_v4, %v641_v61 }
 0x1ee   : > { %1635 = vst [vmem:[%s2096_s21 + $0xdc0] sm:$0xff] %v1123_v1  ;;  %v643_v1 = vld [vmem:[%s2077_s28 + $0xed0] sm:$0xff]  ;;  %v1156_v5 = vmul.f32 %v2087_v4, %v642_v63 }
 0x1ef   : > { %1636 = vst [vmem:[%s2096_s21 + $0xdc8] sm:$0xff] %v1124_v3  ;;  %v644_v3 = vld [vmem:[%s2077_s28 + $0xed8] sm:$0xff]  ;;  %v1157_v7 = vmul.f32 %v2087_v4, %v643_v1 }
 0x1f0   : > { %1637 = vst [vmem:[%s2096_s21 + $0xdd0] sm:$0xff] %v1125_v6  ;;  %v645_v6 = vld [vmem:[%s2077_s28 + $0xee0] sm:$0xff]  ;;  %v1158_v9 = vmul.f32 %v2087_v4, %v644_v3 }
 0x1f1   : > { %1638 = vst [vmem:[%s2096_s21 + $0xdd8] sm:$0xff] %v1126_v8  ;;  %v646_v8 = vld [vmem:[%s2077_s28 + $0xee8] sm:$0xff]  ;;  %v1159_v11 = vmul.f32 %v2087_v4, %v645_v6 }
 0x1f2   : > { %1639 = vst [vmem:[%s2096_s21 + $0xde0] sm:$0xff] %v1127_v10  ;;  %v647_v10 = vld [vmem:[%s2077_s28 + $0xef0] sm:$0xff]  ;;  %v1160_v13 = vmul.f32 %v2087_v4, %v646_v8 }
 0x1f3   : > { %1640 = vst [vmem:[%s2096_s21 + $0xde8] sm:$0xff] %v1128_v12  ;;  %v648_v12 = vld [vmem:[%s2077_s28 + $0xef8] sm:$0xff]  ;;  %v1161_v15 = vmul.f32 %v2087_v4, %v647_v10 }
 0x1f4   : > { %1641 = vst [vmem:[%s2096_s21 + $0xdf0] sm:$0xff] %v1129_v14  ;;  %v649_v14 = vld [vmem:[%s2077_s28 + $0xf00] sm:$0xff]  ;;  %v1162_v17 = vmul.f32 %v2087_v4, %v648_v12 }
 0x1f5   : > { %1642 = vst [vmem:[%s2096_s21 + $0xdf8] sm:$0xff] %v1130_v16  ;;  %v650_v16 = vld [vmem:[%s2077_s28 + $0xf08] sm:$0xff]  ;;  %v1163_v19 = vmul.f32 %v2087_v4, %v649_v14 }
 0x1f6   : > { %1643 = vst [vmem:[%s2096_s21 + $0xe00] sm:$0xff] %v1131_v18  ;;  %v651_v18 = vld [vmem:[%s2077_s28 + $0xf10] sm:$0xff]  ;;  %v1164_v21 = vmul.f32 %v2087_v4, %v650_v16 }
 0x1f7   : > { %1644 = vst [vmem:[%s2096_s21 + $0xe08] sm:$0xff] %v1132_v20  ;;  %v652_v20 = vld [vmem:[%s2077_s28 + $0xf18] sm:$0xff]  ;;  %v1165_v23 = vmul.f32 %v2087_v4, %v651_v18 }
 0x1f8   : > { %1645 = vst [vmem:[%s2096_s21 + $0xe10] sm:$0xff] %v1133_v22  ;;  %v653_v22 = vld [vmem:[%s2077_s28 + $0xf20] sm:$0xff]  ;;  %v1166_v25 = vmul.f32 %v2087_v4, %v652_v20 }
 0x1f9   : > { %1646 = vst [vmem:[%s2096_s21 + $0xe18] sm:$0xff] %v1134_v24  ;;  %v654_v24 = vld [vmem:[%s2077_s28 + $0xf28] sm:$0xff]  ;;  %v1167_v27 = vmul.f32 %v2087_v4, %v653_v22 }
 0x1fa   : > { %1647 = vst [vmem:[%s2096_s21 + $0xe20] sm:$0xff] %v1135_v26  ;;  %v655_v26 = vld [vmem:[%s2077_s28 + $0xf30] sm:$0xff]  ;;  %v1168_v29 = vmul.f32 %v2087_v4, %v654_v24 }
 0x1fb   : > { %1648 = vst [vmem:[%s2096_s21 + $0xe28] sm:$0xff] %v1136_v28  ;;  %v656_v28 = vld [vmem:[%s2077_s28 + $0xf38] sm:$0xff]  ;;  %v1169_v31 = vmul.f32 %v2087_v4, %v655_v26 }
 0x1fc   : > { %1649 = vst [vmem:[%s2096_s21 + $0xe30] sm:$0xff] %v1137_v30  ;;  %v657_v30 = vld [vmem:[%s2077_s28 + $0xf40] sm:$0xff]  ;;  %v1170_v33 = vmul.f32 %v2087_v4, %v656_v28 }
 0x1fd   : > { %1650 = vst [vmem:[%s2096_s21 + $0xe38] sm:$0xff] %v1138_v32  ;;  %v658_v32 = vld [vmem:[%s2077_s28 + $0xf48] sm:$0xff]  ;;  %v1171_v35 = vmul.f32 %v2087_v4, %v657_v30 }
 0x1fe   : > { %1651 = vst [vmem:[%s2096_s21 + $0xe40] sm:$0xff] %v1139_v34  ;;  %v659_v34 = vld [vmem:[%s2077_s28 + $0xf50] sm:$0xff]  ;;  %v1172_v37 = vmul.f32 %v2087_v4, %v658_v32 }
 0x1ff   : > { %1652 = vst [vmem:[%s2096_s21 + $0xe48] sm:$0xff] %v1140_v36  ;;  %v660_v36 = vld [vmem:[%s2077_s28 + $0xf58] sm:$0xff]  ;;  %v1173_v39 = vmul.f32 %v2087_v4, %v659_v34 }
 0x200   : > { %1653 = vst [vmem:[%s2096_s21 + $0xe50] sm:$0xff] %v1141_v38  ;;  %v661_v38 = vld [vmem:[%s2077_s28 + $0xf60] sm:$0xff]  ;;  %v1174_v41 = vmul.f32 %v2087_v4, %v660_v36 }
 0x201   : > { %1654 = vst [vmem:[%s2096_s21 + $0xe58] sm:$0xff] %v1142_v40  ;;  %v662_v40 = vld [vmem:[%s2077_s28 + $0xf68] sm:$0xff]  ;;  %v1175_v43 = vmul.f32 %v2087_v4, %v661_v38 }
 0x202   : > { %1655 = vst [vmem:[%s2096_s21 + $0xe60] sm:$0xff] %v1143_v42  ;;  %v663_v42 = vld [vmem:[%s2077_s28 + $0xf70] sm:$0xff]  ;;  %v1176_v45 = vmul.f32 %v2087_v4, %v662_v40 }
 0x203   : > { %1656 = vst [vmem:[%s2096_s21 + $0xe68] sm:$0xff] %v1144_v44  ;;  %v664_v44 = vld [vmem:[%s2077_s28 + $0xf78] sm:$0xff]  ;;  %v1177_v47 = vmul.f32 %v2087_v4, %v663_v42 }
 0x204   : > { %1657 = vst [vmem:[%s2096_s21 + $0xe70] sm:$0xff] %v1145_v46  ;;  %v665_v46 = vld [vmem:[%s2077_s28 + $0xf80] sm:$0xff]  ;;  %v1178_v49 = vmul.f32 %v2087_v4, %v664_v44 }
 0x205   : > { %1658 = vst [vmem:[%s2096_s21 + $0xe78] sm:$0xff] %v1146_v48  ;;  %v666_v48 = vld [vmem:[%s2077_s28 + $0xf88] sm:$0xff]  ;;  %v1179_v51 = vmul.f32 %v2087_v4, %v665_v46 }
 0x206   : > { %1659 = vst [vmem:[%s2096_s21 + $0xe80] sm:$0xff] %v1147_v50  ;;  %v667_v50 = vld [vmem:[%s2077_s28 + $0xf90] sm:$0xff]  ;;  %v1180_v53 = vmul.f32 %v2087_v4, %v666_v48 }
 0x207   : > { %1660 = vst [vmem:[%s2096_s21 + $0xe88] sm:$0xff] %v1148_v52  ;;  %v668_v52 = vld [vmem:[%s2077_s28 + $0xf98] sm:$0xff]  ;;  %v1181_v55 = vmul.f32 %v2087_v4, %v667_v50 }
 0x208   : > { %1661 = vst [vmem:[%s2096_s21 + $0xe90] sm:$0xff] %v1149_v54  ;;  %v669_v54 = vld [vmem:[%s2077_s28 + $0xfa0] sm:$0xff]  ;;  %v1182_v57 = vmul.f32 %v2087_v4, %v668_v52 }
 0x209   : > { %1662 = vst [vmem:[%s2096_s21 + $0xe98] sm:$0xff] %v1150_v56  ;;  %v670_v56 = vld [vmem:[%s2077_s28 + $0xfa8] sm:$0xff]  ;;  %v1183_v59 = vmul.f32 %v2087_v4, %v669_v54 }
 0x20a   : > { %1663 = vst [vmem:[%s2096_s21 + $0xea0] sm:$0xff] %v1151_v58  ;;  %v671_v58 = vld [vmem:[%s2077_s28 + $0xfb0] sm:$0xff]  ;;  %v1184_v61 = vmul.f32 %v2087_v4, %v670_v56 }
 0x20b   : > { %1664 = vst [vmem:[%s2096_s21 + $0xea8] sm:$0xff] %v1152_v60  ;;  %v672_v60 = vld [vmem:[%s2077_s28 + $0xfb8] sm:$0xff]  ;;  %v1185_v63 = vmul.f32 %v2087_v4, %v671_v58 }
 0x20c   : > { %1665 = vst [vmem:[%s2096_s21 + $0xeb0] sm:$0xff] %v1153_v62  ;;  %v673_v62 = vld [vmem:[%s2077_s28 + $0xfc0] sm:$0xff]  ;;  %v1186_v1 = vmul.f32 %v2087_v4, %v672_v60 }
 0x20d   : > { %1666 = vst [vmem:[%s2096_s21 + $0xeb8] sm:$0xff] %v1154_v0  ;;  %v674_v0 = vld [vmem:[%s2077_s28 + $0xfc8] sm:$0xff]  ;;  %v1187_v3 = vmul.f32 %v2087_v4, %v673_v62 }
 0x20e   : > { %1667 = vst [vmem:[%s2096_s21 + $0xec0] sm:$0xff] %v1155_v2  ;;  %v675_v2 = vld [vmem:[%s2077_s28 + $0xfd0] sm:$0xff]  ;;  %v1188_v6 = vmul.f32 %v2087_v4, %v674_v0 }
 0x20f   : > { %1668 = vst [vmem:[%s2096_s21 + $0xec8] sm:$0xff] %v1156_v5  ;;  %v676_v5 = vld [vmem:[%s2077_s28 + $0xfd8] sm:$0xff]  ;;  %v1189_v8 = vmul.f32 %v2087_v4, %v675_v2 }
 0x210   : > { %1669 = vst [vmem:[%s2096_s21 + $0xed0] sm:$0xff] %v1157_v7  ;;  %v677_v7 = vld [vmem:[%s2077_s28 + $0xfe0] sm:$0xff]  ;;  %v1190_v10 = vmul.f32 %v2087_v4, %v676_v5 }
 0x211   : > { %1670 = vst [vmem:[%s2096_s21 + $0xed8] sm:$0xff] %v1158_v9  ;;  %v678_v9 = vld [vmem:[%s2077_s28 + $0xfe8] sm:$0xff]  ;;  %v1191_v12 = vmul.f32 %v2087_v4, %v677_v7 }
 0x212   : > { %1671 = vst [vmem:[%s2096_s21 + $0xee0] sm:$0xff] %v1159_v11  ;;  %v679_v11 = vld [vmem:[%s2077_s28 + $0xff0] sm:$0xff]  ;;  %v1192_v14 = vmul.f32 %v2087_v4, %v678_v9 }
 0x213   : > { %1672 = vst [vmem:[%s2096_s21 + $0xee8] sm:$0xff] %v1160_v13  ;;  %v680_v13 = vld [vmem:[%s2077_s28 + $0xff8] sm:$0xff] }
 0x214   : > { %1673 = vst [vmem:[%s2096_s21 + $0xef0] sm:$0xff] %v1161_v15  ;;  %v1193_v15 = vmul.f32 %v2087_v4, %v679_v11  ;;  %v1194_v16 = vmul.f32 %v2087_v4, %v680_v13 }
 0x215   : > { %1674 = vst [vmem:[%s2096_s21 + $0xef8] sm:$0xff] %v1162_v17 }
 0x216   : > { %1675 = vst [vmem:[%s2096_s21 + $0xf00] sm:$0xff] %v1163_v19 }
 0x217   : > { %1676 = vst [vmem:[%s2096_s21 + $0xf08] sm:$0xff] %v1164_v21 }
 0x218   : > { %1677 = vst [vmem:[%s2096_s21 + $0xf10] sm:$0xff] %v1165_v23 }
 0x219   : > { %1678 = vst [vmem:[%s2096_s21 + $0xf18] sm:$0xff] %v1166_v25 }
 0x21a   : > { %1679 = vst [vmem:[%s2096_s21 + $0xf20] sm:$0xff] %v1167_v27 }
 0x21b   : > { %1680 = vst [vmem:[%s2096_s21 + $0xf28] sm:$0xff] %v1168_v29 }
 0x21c   : > { %1681 = vst [vmem:[%s2096_s21 + $0xf30] sm:$0xff] %v1169_v31 }
 0x21d   : > { %1682 = vst [vmem:[%s2096_s21 + $0xf38] sm:$0xff] %v1170_v33 }
 0x21e   : > { %1683 = vst [vmem:[%s2096_s21 + $0xf40] sm:$0xff] %v1171_v35 }
 0x21f   : > { %1684 = vst [vmem:[%s2096_s21 + $0xf48] sm:$0xff] %v1172_v37 }
 0x220   : > { %1685 = vst [vmem:[%s2096_s21 + $0xf50] sm:$0xff] %v1173_v39 }
 0x221   : > { %1686 = vst [vmem:[%s2096_s21 + $0xf58] sm:$0xff] %v1174_v41 }
 0x222   : > { %1687 = vst [vmem:[%s2096_s21 + $0xf60] sm:$0xff] %v1175_v43 }
 0x223   : > { %1688 = vst [vmem:[%s2096_s21 + $0xf68] sm:$0xff] %v1176_v45 }
 0x224   : > { %1689 = vst [vmem:[%s2096_s21 + $0xf70] sm:$0xff] %v1177_v47 }
 0x225   : > { %1690 = vst [vmem:[%s2096_s21 + $0xf78] sm:$0xff] %v1178_v49 }
 0x226   : > { %1691 = vst [vmem:[%s2096_s21 + $0xf80] sm:$0xff] %v1179_v51 }
 0x227   : > { %1692 = vst [vmem:[%s2096_s21 + $0xf88] sm:$0xff] %v1180_v53 }
 0x228   : > { %1693 = vst [vmem:[%s2096_s21 + $0xf90] sm:$0xff] %v1181_v55 }
 0x229   : > { %1694 = vst [vmem:[%s2096_s21 + $0xf98] sm:$0xff] %v1182_v57 }
 0x22a   : > { %1695 = vst [vmem:[%s2096_s21 + $0xfa0] sm:$0xff] %v1183_v59 }
 0x22b   : > { %1696 = vst [vmem:[%s2096_s21 + $0xfa8] sm:$0xff] %v1184_v61 }
 0x22c   : > { %1697 = vst [vmem:[%s2096_s21 + $0xfb0] sm:$0xff] %v1185_v63 }
 0x22d   : > { %1698 = vst [vmem:[%s2096_s21 + $0xfb8] sm:$0xff] %v1186_v1 }
 0x22e   : > { %1699 = vst [vmem:[%s2096_s21 + $0xfc0] sm:$0xff] %v1187_v3 }
 0x22f   : > { %1700 = vst [vmem:[%s2096_s21 + $0xfc8] sm:$0xff] %v1188_v6 }
 0x230   : > { %1701 = vst [vmem:[%s2096_s21 + $0xfd0] sm:$0xff] %v1189_v8 }
 0x231   : > { %1702 = vst [vmem:[%s2096_s21 + $0xfd8] sm:$0xff] %v1190_v10 }
 0x232   : > { %1703 = vst [vmem:[%s2096_s21 + $0xfe0] sm:$0xff] %v1191_v12 }
 0x233   : > { %1704 = vst [vmem:[%s2096_s21 + $0xfe8] sm:$0xff] %v1192_v14 }
 0x234   : > { %1705 = vst [vmem:[%s2096_s21 + $0xff0] sm:$0xff] %v1193_v15 }
 0x235   : > { %1706 = vst [vmem:[%s2096_s21 + $0xff8] sm:$0xff] %v1194_v16 }
 0x236   : > { %1924 = shalt.err (!%p1921_p4)
}
 0x237   : > { %s1967_s25 = smov 1024   ;;  %s1968_s26 = smov 64  }
 0x238   : > { %1819 = dma.vmem_to_hbm [thread:$0]  (%p2037_p11), %s1722_s6, 65536, %s1724_s7, %s1708_s8, %s1967_s25, %s1967_s25, %s1968_s26  }
 0x239 PF: > { %s1738_s27 = sand.u32 1, %s1951_s11   ;;  %p3665_p7 = scmp.ge.s32.totalorder %s1963_s14, 2 }
 0x23a   : > { %s1739_s28 = scalar_lea.sflag [#allocation5], %s1738_s27 }
 0x23b   : > { %p1826_p5 = pnand %p3665_p7, %p2041_p12 }
 0x23d   : > { %p1827_p8 = pneg %p1826_p5 }
 0x23f   : > { %1946 = dma.done.wait (%p1827_p8), %s1739_s28, 65536  }
 0x240   : > { %1948 = vsyncadd (%p1827_p8), %s1739_s28, 4294901760  ;;  %p16_p10 = scmp.ge.s32.totalorder %s2012_s16, 4   ;;  %s3666_s11 = smov %s1955_s12 }
 0x241   : > { %s3667_s12 = smov %s1959_s13  ;;  %s3668_s13 = smov %s2024_s19 }
 0x242   : > { %s3669_s14 = smov %s2012_s16  ;;  %18 = sbr.rel (!%p16_p10) target bundleno = 7 (0x7), region = 73 }
 0x247   :  { %1745 = vsyncpa [#allocation4], 1 }
 0x248   :  { %1747 = vsyncpa [#allocation4 + $0x1], 1 }
 0x249   :  { %1748 = vsyncpa [#allocation5], 1 }
 0x24a   :  { %1750 = vsyncpa [#allocation5 + $0x1], 1 }

</bundles_post_ra>
